<compile_context>
chip_gen: v7x
topology: tpu7x:2x2x1
jax: 0.10.0
libtpu: 0.0.40
codegen_flags: <defaults>
</compile_context>

<pallas_src>
import jax
import jax.numpy as jnp
from jax import lax
from jax.experimental import pallas as pl
from jax.experimental.pallas import tpu as pltpu

EPS = 1e-5
# Matmul operand dtype: f32 for tight parity with the f32 reference.
# Use jnp.bfloat16 on v6e/v7x for ~2x MXU throughput (loosen the tolerance).
MXU_DTYPE = jnp.float32


def _ceil_to(x, m):
    return (x + m - 1) // m * m


def _stats(h):
    """Per-channel [sum, sum_sq] of h (ch, L) -> (ch, 2)."""
    s = jnp.sum(h, axis=1, keepdims=True)
    sq = jnp.sum(h * h, axis=1, keepdims=True)
    return jnp.concatenate([s, sq], axis=1)


# ----------------------------- kernels (all NCL-resident) -----------------------------

def k1_reduce(x_ref, wr_ref, h1_ref, st_ref):
    # x_ref: (C, L), wr_ref: (Mc, C)  ->  h1 (Mc, L) + per-channel partial stats.
    h = jnp.dot(wr_ref[...].astype(MXU_DTYPE), x_ref[...].astype(MXU_DTYPE),
                preferred_element_type=jnp.float32)
    h1_ref[...] = h
    st_ref[...] = _stats(h)


def k2_mid(h1_ref, s1_ref, t1_ref, wm_ref, h2_ref, st_ref):
    # Folded BN1 affine + ReLU, then the 3-tap conv as ONE K=3*Mc matmul.
    Mc, L = h1_ref.shape
    a = jnp.maximum(h1_ref[...] * s1_ref[...] + t1_ref[...], 0.0)        # (Mc, L)
    # l-1 / l+1 shifts along the lane (sequence) axis: XLU roll + boundary mask.
    l_idx = lax.broadcasted_iota(jnp.int32, (1, L), 1)
    a_m1 = jnp.where(l_idx == 0, 0.0, pltpu.roll(a, shift=1, axis=1))        # a[:, l-1]
    a_p1 = jnp.where(l_idx == L - 1, 0.0, pltpu.roll(a, shift=L - 1, axis=1))  # a[:, l+1]
    hcat = jnp.concatenate([a_m1, a, a_p1], axis=0)                       # (3*Mc, L)
    h = jnp.dot(wm_ref[...].astype(MXU_DTYPE), hcat.astype(MXU_DTYPE),
                preferred_element_type=jnp.float32)                      # (Mc, L)
    h2_ref[...] = h
    st_ref[...] = _stats(h)


def k3_expand(h2_ref, s2_ref, t2_ref, we_ref, h3_ref, st_ref):
    # Folded BN2 affine + ReLU, 1x1 expand matmul: (C, Mc) @ (Mc, L).
    a = jnp.maximum(h2_ref[...] * s2_ref[...] + t2_ref[...], 0.0)
    h = jnp.dot(we_ref[...].astype(MXU_DTYPE), a.astype(MXU_DTYPE),
                preferred_element_type=jnp.float32)                      # (C, L)
    h3_ref[...] = h
    st_ref[...] = _stats(h)


def k4_residual(h3_ref, x_ref, s3_ref, t3_ref, o_ref):
    # Folded BN3 affine, residual add, ReLU — already in NCL, no transpose needed.
    o_ref[...] = jnp.maximum(h3_ref[...] * s3_ref[...] + t3_ref[...] + x_ref[...], 0.0)


# --------------------------- host helpers ---------------------------

def _bn_affine(partial_stats, gamma, beta, count):
    """Global training-mode BN folded into one per-channel affine (h*scale + shift)."""
    s = jnp.sum(partial_stats, axis=0)                       # (ch, 2)
    mean = s[:, 0] / count
    var = jnp.maximum(s[:, 1] / count - mean * mean, 0.0)    # biased variance
    scale = gamma * lax.rsqrt(var + EPS)
    shift = beta - mean * scale
    return scale.reshape(-1, 1), shift.reshape(-1, 1)        # (ch, 1) for NCL broadcast


def resnet_bottleneck_1d(x_ncl, params):
    """x_ncl: (N, C, L) float32, same layout as the PyTorch module."""
    N, C, L = x_ncl.shape
    mid = params["w_reduce"].shape[0]
    Mc = max(_ceil_to(mid, 8), 8)          # sublane-pad mid channels only (no 128 padding)
    f32 = jnp.float32

    # ---- pack weights / BN params (tiny, host-side) ----
    wr = jnp.zeros((Mc, C), f32).at[:mid, :].set(params["w_reduce"][:, :, 0])
    wm = jnp.zeros((Mc, 3 * Mc), f32)
    for k in range(3):                      # tap k pairs with the input shifted by k-1
        wm = wm.at[:mid, k * Mc:k * Mc + mid].set(params["w_mid"][:, :, k])
    we = jnp.zeros((C, Mc), f32).at[:, :mid].set(params["w_expand"][:, :, 0])

    def pad_vec(v, n):
        return jnp.zeros((n,), f32).at[: v.shape[0]].set(v)

    g1, b1 = pad_vec(params["g_reduce"], Mc), pad_vec(params["b_reduce"], Mc)
    g2, b2 = pad_vec(params["g_mid"], Mc), pad_vec(params["b_mid"], Mc)
    g3, b3 = params["g_expand"].astype(f32), params["b_expand"].astype(f32)

    count = N * L
    cp = pltpu.CompilerParams(dimension_semantics=("parallel",))   # megacore over batch

    act = lambda ch: pl.BlockSpec((None, ch, L), lambda i: (i, 0, 0))    # one batch element
    stat = lambda ch: pl.BlockSpec((None, ch, 2), lambda i: (i, 0, 0))
    vec = lambda ch: pl.BlockSpec((ch, 1), lambda i: (0, 0))             # VMEM-resident
    full = lambda a, b: pl.BlockSpec((a, b), lambda i: (0, 0))           # weights resident

    # ---- K1: 1x1 reduce ----
    h1, st1 = pl.pallas_call(
        k1_reduce, grid=(N,),
        in_specs=[act(C), full(Mc, C)],
        out_specs=(act(Mc), stat(Mc)),
        out_shape=(jax.ShapeDtypeStruct((N, Mc, L), f32),
                   jax.ShapeDtypeStruct((N, Mc, 2), f32)),
        compiler_params=cp,
        cost_estimate=pl.CostEstimate(flops=2 * N * L * C * Mc, transcendentals=0,
                                      bytes_accessed=4 * (N * C * L + Mc * C + N * Mc * L)),
    )(x_ncl, wr)
    s1, t1 = _bn_affine(st1, g1, b1, count)

    # ---- K2: BN1+ReLU fold, 3-tap conv as one matmul ----
    h2, st2 = pl.pallas_call(
        k2_mid, grid=(N,),
        in_specs=[act(Mc), vec(Mc), vec(Mc), full(Mc, 3 * Mc)],
        out_specs=(act(Mc), stat(Mc)),
        out_shape=(jax.ShapeDtypeStruct((N, Mc, L), f32),
                   jax.ShapeDtypeStruct((N, Mc, 2), f32)),
        compiler_params=cp,
        cost_estimate=pl.CostEstimate(flops=2 * N * L * 3 * Mc * Mc, transcendentals=0,
                                      bytes_accessed=4 * (2 * N * Mc * L + 3 * Mc * Mc)),
    )(h1, s1, t1, wm)
    s2, t2 = _bn_affine(st2, g2, b2, count)

    # ---- K3: BN2+ReLU fold, 1x1 expand ----
    h3, st3 = pl.pallas_call(
        k3_expand, grid=(N,),
        in_specs=[act(Mc), vec(Mc), vec(Mc), full(C, Mc)],
        out_specs=(act(C), stat(C)),
        out_shape=(jax.ShapeDtypeStruct((N, C, L), f32),
                   jax.ShapeDtypeStruct((N, C, 2), f32)),
        compiler_params=cp,
        cost_estimate=pl.CostEstimate(flops=2 * N * L * Mc * C, transcendentals=0,
                                      bytes_accessed=4 * (N * Mc * L + Mc * C + N * C * L)),
    )(h2, s2, t2, we)
    s3, t3 = _bn_affine(st3, g3, b3, count)

    # ---- K4: BN3 affine + residual + ReLU (NCL, lane-dense output) ----
    out = pl.pallas_call(
        k4_residual, grid=(N,),
        in_specs=[act(C), act(C), vec(C), vec(C)],
        out_specs=act(C),
        out_shape=jax.ShapeDtypeStruct((N, C, L), f32),
        compiler_params=cp,
        cost_estimate=pl.CostEstimate(flops=4 * N * C * L, transcendentals=0,
                                      bytes_accessed=4 * 3 * N * C * L),
    )(h3, x_ncl, s3, t3)
    return out


# --------------------------- params / reference ---------------------------

def init_params(key, channels, expansion=4):
    mid = channels // expansion
    k1, k2, k3 = jax.random.split(key, 3)
    # PyTorch conv-weight layout (out_ch, in_ch, kernel); BN gamma=1, beta=0 (default init)
    w_reduce = jax.random.normal(k1, (mid, channels, 1), jnp.float32) * 0.1
    w_mid = jax.random.normal(k2, (mid, mid, 3), jnp.float32) * 0.1
    w_expand = jax.random.normal(k3, (channels, mid, 1), jnp.float32) * 0.1
    return dict(
        w_reduce=w_reduce, g_reduce=jnp.ones((mid,)), b_reduce=jnp.zeros((mid,)),
        w_mid=w_mid, g_mid=jnp.ones((mid,)), b_mid=jnp.zeros((mid,)),
        w_expand=w_expand, g_expand=jnp.ones((channels,)), b_expand=jnp.zeros((channels,)),
    )


def ref_forward(x, p):
    """Plain-JAX reference in PyTorch NCL layout, training-mode BN."""
    def conv(h, w, pad):
        return lax.conv_general_dilated(
            h, w, (1,), [(pad, pad)],
            dimension_numbers=("NCH", "OIH", "NCH"),
            precision=lax.Precision.HIGHEST)

    def bn(h, g, b):
        mean = h.mean(axis=(0, 2), keepdims=True)
        var = ((h - mean) ** 2).mean(axis=(0, 2), keepdims=True)
        return (h - mean) / jnp.sqrt(var + EPS) * g[None, :, None] + b[None, :, None]

    h = jax.nn.relu(bn(conv(x, p["w_reduce"], 0), p["g_reduce"], p["b_reduce"]))
    h = jax.nn.relu(bn(conv(h, p["w_mid"], 1), p["g_mid"], p["b_mid"]))
    h = bn(conv(h, p["w_expand"], 0), p["g_expand"], p["b_expand"])
    return jax.nn.relu(h + x)


if __name__ == "__main__":
    N, C, L = 2, 128, 128          # batch=2, channels=128 (mid=32), seq length=128
    key = jax.random.PRNGKey(0)
    kx, kp = jax.random.split(key)
    x = jax.random.normal(kx, (N, C, L), jnp.float32)
    params = init_params(kp, C, expansion=4)

    fwd = jax.jit(resnet_bottleneck_1d)
    out = jax.block_until_ready(fwd(x, params))
    ref = jax.block_until_ready(ref_forward(x, params))

    assert out.shape == x.shape
    err = float(jnp.max(jnp.abs(out - ref)))
    assert jnp.allclose(out, ref, atol=5e-4, rtol=5e-4), err
    print("KERNEL_OK")
</pallas_src>

<mosaic_0001>
module attributes {stable_mosaic.version = 11 : i64} {
  func.func @k1_reduce(%arg0: i32, %arg1: memref<1x128x128xf32, #tpu.memory_space<vmem>>, %arg2: memref<32x128xf32, #tpu.memory_space<vmem>>, %arg3: memref<1x32x128xf32, #tpu.memory_space<vmem>>, %arg4: memref<1x32x2xf32, #tpu.memory_space<vmem>>) attributes {dimension_semantics = [#tpu.dimension_semantics<parallel>], iteration_bounds = array<i64: 2>, scalar_prefetch = 0 : i64, scratch_operands = 0 : i64, tpu.core_type = #tpu.core_type<tc>, window_params = [{transform_indices = @transform_0, window_bounds = array<i64: 1, 128, 128>}, {pipeline_mode = #tpu.pipeline_mode<synchronous>, transform_indices = @transform_1, window_bounds = array<i64: 32, 128>}, {transform_indices = @transform_2, window_bounds = array<i64: 1, 32, 128>}, {transform_indices = @transform_3, window_bounds = array<i64: 1, 32, 2>}]} {
    %c0 = arith.constant 0 : index
    %c0_0 = arith.constant 0 : index
    %0 = vector.load %arg2[%c0, %c0_0] : memref<32x128xf32, #tpu.memory_space<vmem>>, vector<32x128xf32>
    %c0_1 = arith.constant 0 : index
    %c0_2 = arith.constant 0 : index
    %c0_3 = arith.constant 0 : index
    %1 = vector.load %arg1[%c0_1, %c0_2, %c0_3] : memref<1x128x128xf32, #tpu.memory_space<vmem>>, vector<1x128x128xf32>
    %2 = vector.shape_cast %1 : vector<1x128x128xf32> to vector<128x128xf32>
    %cst = arith.constant dense<0.000000e+00> : vector<32x128xf32>
    %3 = tpu.matmul %0, %2, %cst {dimension_numbers = #tpu.dot_dimension_numbers<[1], [0], [0], [1], [0, 0, 1, 1], [], []>} : vector<32x128xf32>, vector<128x128xf32>, vector<32x128xf32> -> vector<32x128xf32>
    %c0_4 = arith.constant 0 : index
    %c0_5 = arith.constant 0 : index
    %c0_6 = arith.constant 0 : index
    %4 = vector.load %arg3[%c0_4, %c0_5, %c0_6] : memref<1x32x128xf32, #tpu.memory_space<vmem>>, vector<1x32x128xf32>
    %5 = vector.shape_cast %4 : vector<1x32x128xf32> to vector<32x128xf32>
    %6 = vector.shape_cast %3 : vector<32x128xf32> to vector<1x32x128xf32>
    tpu.vector_store %arg3[%c0_4, %c0_5, %c0_6], %6 {strides = array<i32>} : memref<1x32x128xf32, #tpu.memory_space<vmem>>, vector<1x32x128xf32>,
    %cst_7 = arith.constant dense<0.000000e+00> : vector<32xf32>
    %7 = vector.multi_reduction <add>, %3, %cst_7 [1] : vector<32x128xf32> to vector<32xf32>
    %8 = vector.shape_cast %7 : vector<32xf32> to vector<32x1xf32>
    %9 = arith.mulf %3, %3 : vector<32x128xf32>
    %cst_8 = arith.constant dense<0.000000e+00> : vector<32xf32>
    %10 = vector.multi_reduction <add>, %9, %cst_8 [1] : vector<32x128xf32> to vector<32xf32>
    %11 = vector.shape_cast %10 : vector<32xf32> to vector<32x1xf32>
    %12 = tpu.concatenate %8, %11 in 1 : vector<32x1xf32>, vector<32x1xf32> -> vector<32x2xf32>
    %c0_9 = arith.constant 0 : index
    %c0_10 = arith.constant 0 : index
    %c0_11 = arith.constant 0 : index
    %13 = vector.load %arg4[%c0_9, %c0_10, %c0_11] : memref<1x32x2xf32, #tpu.memory_space<vmem>>, vector<1x32x2xf32>
    %14 = vector.shape_cast %13 : vector<1x32x2xf32> to vector<32x2xf32>
    %15 = vector.shape_cast %12 : vector<32x2xf32> to vector<1x32x2xf32>
    tpu.vector_store %arg4[%c0_9, %c0_10, %c0_11], %15 {strides = array<i32>} : memref<1x32x2xf32, #tpu.memory_space<vmem>>, vector<1x32x2xf32>,
    return
  }
  func.func @transform_0(%arg0: i32) -> (i32, i32, i32) {
    %c0_i32 = arith.constant 0 : i32
    %c0_i32_0 = arith.constant 0 : i32
    %c0_i32_1 = arith.constant 0 : i32
    return %arg0, %c0_i32, %c0_i32_0 : i32, i32, i32
  }
  func.func @transform_1(%arg0: i32) -> (i32, i32) {
    %c0_i32 = arith.constant 0 : i32
    %c0_i32_0 = arith.constant 0 : i32
    %c0_i32_1 = arith.constant 0 : i32
    return %c0_i32, %c0_i32_0 : i32, i32
  }
  func.func @transform_2(%arg0: i32) -> (i32, i32, i32) {
    %c0_i32 = arith.constant 0 : i32
    %c0_i32_0 = arith.constant 0 : i32
    %c0_i32_1 = arith.constant 0 : i32
    return %arg0, %c0_i32, %c0_i32_0 : i32, i32, i32
  }
  func.func @transform_3(%arg0: i32) -> (i32, i32, i32) {
    %c0_i32 = arith.constant 0 : i32
    %c0_i32_0 = arith.constant 0 : i32
    %c0_i32_1 = arith.constant 0 : i32
    return %arg0, %c0_i32, %c0_i32_0 : i32, i32, i32
  }
}

module attributes {stable_mosaic.version = 11 : i64} {
  func.func @k2_mid(%arg0: i32, %arg1: memref<1x32x128xf32, #tpu.memory_space<vmem>>, %arg2: memref<32x1xf32, #tpu.memory_space<vmem>>, %arg3: memref<32x1xf32, #tpu.memory_space<vmem>>, %arg4: memref<32x96xf32, #tpu.memory_space<vmem>>, %arg5: memref<1x32x128xf32, #tpu.memory_space<vmem>>, %arg6: memref<1x32x2xf32, #tpu.memory_space<vmem>>) attributes {dimension_semantics = [#tpu.dimension_semantics<parallel>], iteration_bounds = array<i64: 2>, scalar_prefetch = 0 : i64, scratch_operands = 0 : i64, tpu.core_type = #tpu.core_type<tc>, window_params = [{transform_indices = @transform_0, window_bounds = array<i64: 1, 32, 128>}, {pipeline_mode = #tpu.pipeline_mode<synchronous>, transform_indices = @transform_1, window_bounds = array<i64: 32, 1>}, {pipeline_mode = #tpu.pipeline_mode<synchronous>, transform_indices = @transform_2, window_bounds = array<i64: 32, 1>}, {pipeline_mode = #tpu.pipeline_mode<synchronous>, transform_indices = @transform_3, window_bounds = array<i64: 32, 96>}, {transform_indices = @transform_4, window_bounds = array<i64: 1, 32, 128>}, {transform_indices = @transform_5, window_bounds = array<i64: 1, 32, 2>}]} {
    %c0 = arith.constant 0 : index
    %c0_0 = arith.constant 0 : index
    %c0_1 = arith.constant 0 : index
    %0 = vector.load %arg1[%c0, %c0_0, %c0_1] : memref<1x32x128xf32, #tpu.memory_space<vmem>>, vector<1x32x128xf32>
    %1 = vector.shape_cast %0 : vector<1x32x128xf32> to vector<32x128xf32>
    %c0_2 = arith.constant 0 : index
    %c0_3 = arith.constant 0 : index
    %2 = vector.load %arg2[%c0_2, %c0_3] : memref<32x1xf32, #tpu.memory_space<vmem>>, vector<32x1xf32>
    %3 = vector.broadcast %2 : vector<32x1xf32> to vector<32x128xf32>
    %4 = arith.mulf %1, %3 : vector<32x128xf32>
    %c0_4 = arith.constant 0 : index
    %c0_5 = arith.constant 0 : index
    %5 = vector.load %arg3[%c0_4, %c0_5] : memref<32x1xf32, #tpu.memory_space<vmem>>, vector<32x1xf32>
    %6 = vector.broadcast %5 : vector<32x1xf32> to vector<32x128xf32>
    %7 = arith.addf %4, %6 : vector<32x128xf32>
    %cst = arith.constant 0.000000e+00 : f32
    %8 = vector.broadcast %cst : f32 to vector<32x128xf32>
    %9 = arith.maximumf %7, %8 : vector<32x128xf32>
    %10 = tpu.iota {dimensions = array<i32: 1>} : vector<1x128xi32>
    %c0_i32 = arith.constant 0 : i32
    %11 = vector.broadcast %c0_i32 : i32 to vector<1x128xi32>
    %12 = arith.cmpi eq, %10, %11 : vector<1x128xi32>
    %c1_i32 = arith.constant 1 : i32
    %13 = tpu.dynamic_rotate %9 by %c1_i32 dim 1 : vector<32x128xf32>, i32 -> vector<32x128xf32>
    %cst_6 = arith.constant 0.000000e+00 : f32
    %14 = vector.shape_cast %12 : vector<1x128xi1> to vector<1x128xi1>
    %15 = vector.broadcast %14 : vector<1x128xi1> to vector<32x128xi1>
    %16 = vector.broadcast %cst_6 : f32 to vector<32x128xf32>
    %17 = arith.select %15, %16, %13 : vector<32x128xi1>, vector<32x128xf32>
    %c127_i32 = arith.constant 127 : i32
    %18 = vector.broadcast %c127_i32 : i32 to vector<1x128xi32>
    %19 = arith.cmpi eq, %10, %18 : vector<1x128xi32>
    %c127_i32_7 = arith.constant 127 : i32
    %20 = tpu.dynamic_rotate %9 by %c127_i32_7 dim 1 : vector<32x128xf32>, i32 -> vector<32x128xf32>
    %cst_8 = arith.constant 0.000000e+00 : f32
    %21 = vector.shape_cast %19 : vector<1x128xi1> to vector<1x128xi1>
    %22 = vector.broadcast %21 : vector<1x128xi1> to vector<32x128xi1>
    %23 = vector.broadcast %cst_8 : f32 to vector<32x128xf32>
    %24 = arith.select %22, %23, %20 : vector<32x128xi1>, vector<32x128xf32>
    %25 = tpu.concatenate %17, %9, %24 in 0 : vector<32x128xf32>, vector<32x128xf32>, vector<32x128xf32> -> vector<96x128xf32>
    %c0_9 = arith.constant 0 : index
    %c0_10 = arith.constant 0 : index
    %26 = vector.load %arg4[%c0_9, %c0_10] : memref<32x96xf32, #tpu.memory_space<vmem>>, vector<32x96xf32>
    %cst_11 = arith.constant dense<0.000000e+00> : vector<32x128xf32>
    %27 = tpu.matmul %26, %25, %cst_11 {dimension_numbers = #tpu.dot_dimension_numbers<[1], [0], [0], [1], [0, 0, 1, 1], [], []>} : vector<32x96xf32>, vector<96x128xf32>, vector<32x128xf32> -> vector<32x128xf32>
    %c0_12 = arith.constant 0 : index
    %c0_13 = arith.constant 0 : index
    %c0_14 = arith.constant 0 : index
    %28 = vector.load %arg5[%c0_12, %c0_13, %c0_14] : memref<1x32x128xf32, #tpu.memory_space<vmem>>, vector<1x32x128xf32>
    %29 = vector.shape_cast %28 : vector<1x32x128xf32> to vector<32x128xf32>
    %30 = vector.shape_cast %27 : vector<32x128xf32> to vector<1x32x128xf32>
    tpu.vector_store %arg5[%c0_12, %c0_13, %c0_14], %30 {strides = array<i32>} : memref<1x32x128xf32, #tpu.memory_space<vmem>>, vector<1x32x128xf32>,
    %cst_15 = arith.constant dense<0.000000e+00> : vector<32xf32>
    %31 = vector.multi_reduction <add>, %27, %cst_15 [1] : vector<32x128xf32> to vector<32xf32>
    %32 = vector.shape_cast %31 : vector<32xf32> to vector<32x1xf32>
    %33 = arith.mulf %27, %27 : vector<32x128xf32>
    %cst_16 = arith.constant dense<0.000000e+00> : vector<32xf32>
    %34 = vector.multi_reduction <add>, %33, %cst_16 [1] : vector<32x128xf32> to vector<32xf32>
    %35 = vector.shape_cast %34 : vector<32xf32> to vector<32x1xf32>
    %36 = tpu.concatenate %32, %35 in 1 : vector<32x1xf32>, vector<32x1xf32> -> vector<32x2xf32>
    %c0_17 = arith.constant 0 : index
    %c0_18 = arith.constant 0 : index
    %c0_19 = arith.constant 0 : index
    %37 = vector.load %arg6[%c0_17, %c0_18, %c0_19] : memref<1x32x2xf32, #tpu.memory_space<vmem>>, vector<1x32x2xf32>
    %38 = vector.shape_cast %37 : vector<1x32x2xf32> to vector<32x2xf32>
    %39 = vector.shape_cast %36 : vector<32x2xf32> to vector<1x32x2xf32>
    tpu.vector_store %arg6[%c0_17, %c0_18, %c0_19], %39 {strides = array<i32>} : memref<1x32x2xf32, #tpu.memory_space<vmem>>, vector<1x32x2xf32>,
    return
  }
  func.func @transform_0(%arg0: i32) -> (i32, i32, i32) {
    %c0_i32 = arith.constant 0 : i32
    %c0_i32_0 = arith.constant 0 : i32
    %c0_i32_1 = arith.constant 0 : i32
    return %arg0, %c0_i32, %c0_i32_0 : i32, i32, i32
  }
  func.func @transform_1(%arg0: i32) -> (i32, i32) {
    %c0_i32 = arith.constant 0 : i32
    %c0_i32_0 = arith.constant 0 : i32
    %c0_i32_1 = arith.constant 0 : i32
    return %c0_i32, %c0_i32_0 : i32, i32
  }
  func.func @transform_2(%arg0: i32) -> (i32, i32) {
    %c0_i32 = arith.constant 0 : i32
    %c0_i32_0 = arith.constant 0 : i32
    %c0_i32_1 = arith.constant 0 : i32
    return %c0_i32, %c0_i32_0 : i32, i32
  }
  func.func @transform_3(%arg0: i32) -> (i32, i32) {
    %c0_i32 = arith.constant 0 : i32
    %c0_i32_0 = arith.constant 0 : i32
    %c0_i32_1 = arith.constant 0 : i32
    return %c0_i32, %c0_i32_0 : i32, i32
  }
  func.func @transform_4(%arg0: i32) -> (i32, i32, i32) {
    %c0_i32 = arith.constant 0 : i32
    %c0_i32_0 = arith.constant 0 : i32
    %c0_i32_1 = arith.constant 0 : i32
    return %arg0, %c0_i32, %c0_i32_0 : i32, i32, i32
  }
  func.func @transform_5(%arg0: i32) -> (i32, i32, i32) {
    %c0_i32 = arith.constant 0 : i32
    %c0_i32_0 = arith.constant 0 : i32
    %c0_i32_1 = arith.constant 0 : i32
    return %arg0, %c0_i32, %c0_i32_0 : i32, i32, i32
  }
}

module attributes {stable_mosaic.version = 11 : i64} {
  func.func @k3_expand(%arg0: i32, %arg1: memref<1x32x128xf32, #tpu.memory_space<vmem>>, %arg2: memref<32x1xf32, #tpu.memory_space<vmem>>, %arg3: memref<32x1xf32, #tpu.memory_space<vmem>>, %arg4: memref<128x32xf32, #tpu.memory_space<vmem>>, %arg5: memref<1x128x128xf32, #tpu.memory_space<vmem>>, %arg6: memref<1x128x2xf32, #tpu.memory_space<vmem>>) attributes {dimension_semantics = [#tpu.dimension_semantics<parallel>], iteration_bounds = array<i64: 2>, scalar_prefetch = 0 : i64, scratch_operands = 0 : i64, tpu.core_type = #tpu.core_type<tc>, window_params = [{transform_indices = @transform_0, window_bounds = array<i64: 1, 32, 128>}, {pipeline_mode = #tpu.pipeline_mode<synchronous>, transform_indices = @transform_1, window_bounds = array<i64: 32, 1>}, {pipeline_mode = #tpu.pipeline_mode<synchronous>, transform_indices = @transform_2, window_bounds = array<i64: 32, 1>}, {pipeline_mode = #tpu.pipeline_mode<synchronous>, transform_indices = @transform_3, window_bounds = array<i64: 128, 32>}, {transform_indices = @transform_4, window_bounds = array<i64: 1, 128, 128>}, {transform_indices = @transform_5, window_bounds = array<i64: 1, 128, 2>}]} {
    %c0 = arith.constant 0 : index
    %c0_0 = arith.constant 0 : index
    %c0_1 = arith.constant 0 : index
    %0 = vector.load %arg1[%c0, %c0_0, %c0_1] : memref<1x32x128xf32, #tpu.memory_space<vmem>>, vector<1x32x128xf32>
    %1 = vector.shape_cast %0 : vector<1x32x128xf32> to vector<32x128xf32>
    %c0_2 = arith.constant 0 : index
    %c0_3 = arith.constant 0 : index
    %2 = vector.load %arg2[%c0_2, %c0_3] : memref<32x1xf32, #tpu.memory_space<vmem>>, vector<32x1xf32>
    %3 = vector.broadcast %2 : vector<32x1xf32> to vector<32x128xf32>
    %4 = arith.mulf %1, %3 : vector<32x128xf32>
    %c0_4 = arith.constant 0 : index
    %c0_5 = arith.constant 0 : index
    %5 = vector.load %arg3[%c0_4, %c0_5] : memref<32x1xf32, #tpu.memory_space<vmem>>, vector<32x1xf32>
    %6 = vector.broadcast %5 : vector<32x1xf32> to vector<32x128xf32>
    %7 = arith.addf %4, %6 : vector<32x128xf32>
    %cst = arith.constant 0.000000e+00 : f32
    %8 = vector.broadcast %cst : f32 to vector<32x128xf32>
    %9 = arith.maximumf %7, %8 : vector<32x128xf32>
    %c0_6 = arith.constant 0 : index
    %c0_7 = arith.constant 0 : index
    %10 = vector.load %arg4[%c0_6, %c0_7] : memref<128x32xf32, #tpu.memory_space<vmem>>, vector<128x32xf32>
    %cst_8 = arith.constant dense<0.000000e+00> : vector<128x128xf32>
    %11 = tpu.matmul %10, %9, %cst_8 {dimension_numbers = #tpu.dot_dimension_numbers<[1], [0], [0], [1], [0, 0, 1, 1], [], []>} : vector<128x32xf32>, vector<32x128xf32>, vector<128x128xf32> -> vector<128x128xf32>
    %c0_9 = arith.constant 0 : index
    %c0_10 = arith.constant 0 : index
    %c0_11 = arith.constant 0 : index
    %12 = vector.load %arg5[%c0_9, %c0_10, %c0_11] : memref<1x128x128xf32, #tpu.memory_space<vmem>>, vector<1x128x128xf32>
    %13 = vector.shape_cast %12 : vector<1x128x128xf32> to vector<128x128xf32>
    %14 = vector.shape_cast %11 : vector<128x128xf32> to vector<1x128x128xf32>
    tpu.vector_store %arg5[%c0_9, %c0_10, %c0_11], %14 {strides = array<i32>} : memref<1x128x128xf32, #tpu.memory_space<vmem>>, vector<1x128x128xf32>,
    %cst_12 = arith.constant dense<0.000000e+00> : vector<128xf32>
    %15 = vector.multi_reduction <add>, %11, %cst_12 [1] : vector<128x128xf32> to vector<128xf32>
    %16 = vector.shape_cast %15 : vector<128xf32> to vector<128x1xf32>
    %17 = arith.mulf %11, %11 : vector<128x128xf32>
    %cst_13 = arith.constant dense<0.000000e+00> : vector<128xf32>
    %18 = vector.multi_reduction <add>, %17, %cst_13 [1] : vector<128x128xf32> to vector<128xf32>
    %19 = vector.shape_cast %18 : vector<128xf32> to vector<128x1xf32>
    %20 = tpu.concatenate %16, %19 in 1 : vector<128x1xf32>, vector<128x1xf32> -> vector<128x2xf32>
    %c0_14 = arith.constant 0 : index
    %c0_15 = arith.constant 0 : index
    %c0_16 = arith.constant 0 : index
    %21 = vector.load %arg6[%c0_14, %c0_15, %c0_16] : memref<1x128x2xf32, #tpu.memory_space<vmem>>, vector<1x128x2xf32>
    %22 = vector.shape_cast %21 : vector<1x128x2xf32> to vector<128x2xf32>
    %23 = vector.shape_cast %20 : vector<128x2xf32> to vector<1x128x2xf32>
    tpu.vector_store %arg6[%c0_14, %c0_15, %c0_16], %23 {strides = array<i32>} : memref<1x128x2xf32, #tpu.memory_space<vmem>>, vector<1x128x2xf32>,
    return
  }
  func.func @transform_0(%arg0: i32) -> (i32, i32, i32) {
    %c0_i32 = arith.constant 0 : i32
    %c0_i32_0 = arith.constant 0 : i32
    %c0_i32_1 = arith.constant 0 : i32
    return %arg0, %c0_i32, %c0_i32_0 : i32, i32, i32
  }
  func.func @transform_1(%arg0: i32) -> (i32, i32) {
    %c0_i32 = arith.constant 0 : i32
    %c0_i32_0 = arith.constant 0 : i32
    %c0_i32_1 = arith.constant 0 : i32
    return %c0_i32, %c0_i32_0 : i32, i32
  }
  func.func @transform_2(%arg0: i32) -> (i32, i32) {
    %c0_i32 = arith.constant 0 : i32
    %c0_i32_0 = arith.constant 0 : i32
    %c0_i32_1 = arith.constant 0 : i32
    return %c0_i32, %c0_i32_0 : i32, i32
  }
  func.func @transform_3(%arg0: i32) -> (i32, i32) {
    %c0_i32 = arith.constant 0 : i32
    %c0_i32_0 = arith.constant 0 : i32
    %c0_i32_1 = arith.constant 0 : i32
    return %c0_i32, %c0_i32_0 : i32, i32
  }
  func.func @transform_4(%arg0: i32) -> (i32, i32, i32) {
    %c0_i32 = arith.constant 0 : i32
    %c0_i32_0 = arith.constant 0 : i32
    %c0_i32_1 = arith.constant 0 : i32
    return %arg0, %c0_i32, %c0_i32_0 : i32, i32, i32
  }
  func.func @transform_5(%arg0: i32) -> (i32, i32, i32) {
    %c0_i32 = arith.constant 0 : i32
    %c0_i32_0 = arith.constant 0 : i32
    %c0_i32_1 = arith.constant 0 : i32
    return %arg0, %c0_i32, %c0_i32_0 : i32, i32, i32
  }
}

module attributes {stable_mosaic.version = 11 : i64} {
  func.func @k4_residual(%arg0: i32, %arg1: memref<1x128x128xf32, #tpu.memory_space<vmem>>, %arg2: memref<1x128x128xf32, #tpu.memory_space<vmem>>, %arg3: memref<128x1xf32, #tpu.memory_space<vmem>>, %arg4: memref<128x1xf32, #tpu.memory_space<vmem>>, %arg5: memref<1x128x128xf32, #tpu.memory_space<vmem>>) attributes {dimension_semantics = [#tpu.dimension_semantics<parallel>], iteration_bounds = array<i64: 2>, scalar_prefetch = 0 : i64, scratch_operands = 0 : i64, tpu.core_type = #tpu.core_type<tc>, window_params = [{transform_indices = @transform_0, window_bounds = array<i64: 1, 128, 128>}, {transform_indices = @transform_1, window_bounds = array<i64: 1, 128, 128>}, {pipeline_mode = #tpu.pipeline_mode<synchronous>, transform_indices = @transform_2, window_bounds = array<i64: 128, 1>}, {pipeline_mode = #tpu.pipeline_mode<synchronous>, transform_indices = @transform_3, window_bounds = array<i64: 128, 1>}, {transform_indices = @transform_4, window_bounds = array<i64: 1, 128, 128>}]} {
    %c0 = arith.constant 0 : index
    %c0_0 = arith.constant 0 : index
    %c0_1 = arith.constant 0 : index
    %0 = vector.load %arg1[%c0, %c0_0, %c0_1] : memref<1x128x128xf32, #tpu.memory_space<vmem>>, vector<1x128x128xf32>
    %1 = vector.shape_cast %0 : vector<1x128x128xf32> to vector<128x128xf32>
    %c0_2 = arith.constant 0 : index
    %c0_3 = arith.constant 0 : index
    %2 = vector.load %arg3[%c0_2, %c0_3] : memref<128x1xf32, #tpu.memory_space<vmem>>, vector<128x1xf32>
    %3 = vector.broadcast %2 : vector<128x1xf32> to vector<128x128xf32>
    %4 = arith.mulf %1, %3 : vector<128x128xf32>
    %c0_4 = arith.constant 0 : index
    %c0_5 = arith.constant 0 : index
    %5 = vector.load %arg4[%c0_4, %c0_5] : memref<128x1xf32, #tpu.memory_space<vmem>>, vector<128x1xf32>
    %6 = vector.broadcast %5 : vector<128x1xf32> to vector<128x128xf32>
    %7 = arith.addf %4, %6 : vector<128x128xf32>
    %c0_6 = arith.constant 0 : index
    %c0_7 = arith.constant 0 : index
    %c0_8 = arith.constant 0 : index
    %8 = vector.load %arg2[%c0_6, %c0_7, %c0_8] : memref<1x128x128xf32, #tpu.memory_space<vmem>>, vector<1x128x128xf32>
    %9 = vector.shape_cast %8 : vector<1x128x128xf32> to vector<128x128xf32>
    %10 = arith.addf %7, %9 : vector<128x128xf32>
    %cst = arith.constant 0.000000e+00 : f32
    %11 = vector.broadcast %cst : f32 to vector<128x128xf32>
    %12 = arith.maximumf %10, %11 : vector<128x128xf32>
    %c0_9 = arith.constant 0 : index
    %c0_10 = arith.constant 0 : index
    %c0_11 = arith.constant 0 : index
    %13 = vector.load %arg5[%c0_9, %c0_10, %c0_11] : memref<1x128x128xf32, #tpu.memory_space<vmem>>, vector<1x128x128xf32>
    %14 = vector.shape_cast %13 : vector<1x128x128xf32> to vector<128x128xf32>
    %15 = vector.shape_cast %12 : vector<128x128xf32> to vector<1x128x128xf32>
    tpu.vector_store %arg5[%c0_9, %c0_10, %c0_11], %15 {strides = array<i32>} : memref<1x128x128xf32, #tpu.memory_space<vmem>>, vector<1x128x128xf32>,
    return
  }
  func.func @transform_0(%arg0: i32) -> (i32, i32, i32) {
    %c0_i32 = arith.constant 0 : i32
    %c0_i32_0 = arith.constant 0 : i32
    %c0_i32_1 = arith.constant 0 : i32
    return %arg0, %c0_i32, %c0_i32_0 : i32, i32, i32
  }
  func.func @transform_1(%arg0: i32) -> (i32, i32, i32) {
    %c0_i32 = arith.constant 0 : i32
    %c0_i32_0 = arith.constant 0 : i32
    %c0_i32_1 = arith.constant 0 : i32
    return %arg0, %c0_i32, %c0_i32_0 : i32, i32, i32
  }
  func.func @transform_2(%arg0: i32) -> (i32, i32) {
    %c0_i32 = arith.constant 0 : i32
    %c0_i32_0 = arith.constant 0 : i32
    %c0_i32_1 = arith.constant 0 : i32
    return %c0_i32, %c0_i32_0 : i32, i32
  }
  func.func @transform_3(%arg0: i32) -> (i32, i32) {
    %c0_i32 = arith.constant 0 : i32
    %c0_i32_0 = arith.constant 0 : i32
    %c0_i32_1 = arith.constant 0 : i32
    return %c0_i32, %c0_i32_0 : i32, i32
  }
  func.func @transform_4(%arg0: i32) -> (i32, i32, i32) {
    %c0_i32 = arith.constant 0 : i32
    %c0_i32_0 = arith.constant 0 : i32
    %c0_i32_1 = arith.constant 0 : i32
    return %arg0, %c0_i32, %c0_i32_0 : i32, i32, i32
  }
}

</mosaic_0001>

<bundles_post_ra>
// kernel: resnet_bottleneck_1d.4
= control target key start
LH: loop header
LB: loop body
LE: loop exit
PB: predicated region body
PF: predicated region fallthrough
CT: control target
= control target key end

     0   :  { %s569_s12 = smov 0   ;;  %s623_s0 = inlined_call_operand.vmem [shape: f32[2,128,128], index: 0, kind: input, shape index: {}]   ;;  %s624_s1 = inlined_call_operand.vmem [shape: f32[32,128], index: 1, kind: input, shape index: {}]   ;;  %s625_s2 = inlined_call_operand.vmem [shape: f32[2,32,128], index: 2, kind: output, shape index: {0}]   ;;  %s626_s3 = inlined_call_operand.vmem [shape: f32[2,32,2], index: 3, kind: output, shape index: {1}]  }
   0x1 LB: > { %s411_s13 = sadd.s32 4294967295, %s547_s12   ;;  %p415_p0 = scmp.ge.s32.totalorder %s547_s12, 1  ;;  %s547_s12 = sphi %s569_s12, %s14_s12  }
   0x2   : > { %p140_p1 = scmp.lt.s32.totalorder %s547_s12, 3 }
   0x4   : > { %p141_p2 = pnand %p415_p0, %p140_p1 }
   0x5   : > { %p169_p3 = scmp.lt.s32.totalorder (!%p141_p2), %s411_s13, 1  ;;  %v184_v0 = vld [vmem:[%s624_s1] sm:$0xff] (!%p141_p2)  ;;  %v186_v1 = vld [vmem:[%s624_s1 + $0x10] sm:$0xff] (!%p141_p2)  ;;  %v185_v26 = vld [vmem:[%s624_s1 + $0x8] sm:$0xff] (!%p141_p2)  ;;  %vm313_vm0 = vcmask (!%p141_p2), 7168   ;;  %vm318_vm1 = vcmask (!%p141_p2), 15360  }
   0x6   : > { %144 = sbr.rel (%p141_p2) target bundleno = 419 (0x1a3), region = 28  ;;  %479 = vmatprep.mubr.f32.mxu0 (!%p141_p2), %v184_v0  ;;  %482 = vmatprep.mubr.f32.mxu1 (!%p141_p2), %v186_v1  ;;  %v187_v27 = vld [vmem:[%s624_s1 + $0x18] sm:$0xff] (!%p141_p2) }
   0xd   : > { %s628_s13 = smov (!%p169_p3, %s411_s13), 1 }
   0xe   : > { %s424_s18 = sshll.u32 %s628_s13, 7  ;;  %s425_s26 = sshll.u32 %s628_s13, 5 }
   0xf   : > { %s589_s21 = scalar_lea.vmem %s623_s0, %s424_s18  ;;  %s178_s29 = scalar_lea.vmem %s625_s2, %s425_s26 }
  0x10   : > { %v188_v2 = vld [vmem:[%s589_s21] sm:$0xff]  ;;  %v189_v3 = vld [vmem:[%s589_s21 + $0x8] sm:$0xff]  ;;  %v190_v4 = vld [vmem:[%s589_s21 + $0x10] sm:$0xff]  ;;  %s183_s5 = scalar_lea.vmem %s626_s3, %s425_s26 }
  0x11   : > { %v485_v5 = vpack.c.bf16 %v189_v3, %v188_v2  ;;  %v191_v6 = vld [vmem:[%s589_s21 + $0x18] sm:$0xff]  ;;  %v192_v8 = vld [vmem:[%s589_s21 + $0x20] sm:$0xff]  ;;  %v193_v9 = vld [vmem:[%s589_s21 + $0x28] sm:$0xff] }
  0x12   : > { %v489_v7 = vpack.c.bf16 %v191_v6, %v190_v4  ;;  %v493_v10 = vpack.c.bf16 %v193_v9, %v192_v8  ;;  %v194_v11 = vld [vmem:[%s589_s21 + $0x30] sm:$0xff]  ;;  %v195_v12 = vld [vmem:[%s589_s21 + $0x38] sm:$0xff]  ;;  %v196_v14 = vld [vmem:[%s589_s21 + $0x40] sm:$0xff] }
  0x13   : > { %486 = vmatprep.subr.bf16.mxu0 %v485_v5  ;;  %517 = vmatprep.subr.bf16.mxu1 %v485_v5  ;;  %v497_v13 = vpack.c.bf16 %v195_v12, %v194_v11  ;;  %v197_v15 = vld [vmem:[%s589_s21 + $0x48] sm:$0xff]  ;;  %v198_v17 = vld [vmem:[%s589_s21 + $0x50] sm:$0xff]  ;;  %v199_v18 = vld [vmem:[%s589_s21 + $0x58] sm:$0xff] }
  0x14   : > { %488 = vmatpush3.bf16.msra.mxu0 %v485_v5  ;;  %525 = vmatpush3.bf16.msra.mxu1 %v485_v5  ;;  %v501_v16 = vpack.c.bf16 %v197_v15, %v196_v14  ;;  %v505_v19 = vpack.c.bf16 %v199_v18, %v198_v17  ;;  %v200_v20 = vld [vmem:[%s589_s21 + $0x60] sm:$0xff]  ;;  %v201_v21 = vld [vmem:[%s589_s21 + $0x68] sm:$0xff]  ;;  %v202_v23 = vld [vmem:[%s589_s21 + $0x70] sm:$0xff] }
  0x15   : > { %490 = vmatprep.subr.bf16.mxu0 %v489_v7  ;;  %518 = vmatprep.subr.bf16.mxu1 %v489_v7  ;;  %v509_v22 = vpack.c.bf16 %v201_v21, %v200_v20  ;;  %v203_v24 = vld [vmem:[%s589_s21 + $0x78] sm:$0xff] }
  0x16   : > { %v513_v25 = vpack.c.bf16 %v203_v24, %v202_v23 }
  0x18   : > { %492 = vmatpush3.bf16.msra.mxu0 %v489_v7  ;;  %526 = vmatpush3.bf16.msra.mxu1 %v489_v7 }
  0x19   : > { %494 = vmatprep.subr.bf16.mxu0 %v493_v10  ;;  %519 = vmatprep.subr.bf16.mxu1 %v493_v10 }
  0x1c   : > { %496 = vmatpush3.bf16.msra.mxu0 %v493_v10  ;;  %527 = vmatpush3.bf16.msra.mxu1 %v493_v10 }
  0x1d   : > { %498 = vmatprep.subr.bf16.mxu0 %v497_v13  ;;  %520 = vmatprep.subr.bf16.mxu1 %v497_v13 }
  0x20   : > { %500 = vmatpush3.bf16.msra.mxu0 %v497_v13  ;;  %528 = vmatpush3.bf16.msra.mxu1 %v497_v13 }
  0x21   : > { %502 = vmatprep.subr.bf16.mxu0 %v501_v16  ;;  %521 = vmatprep.subr.bf16.mxu1 %v501_v16 }
  0x24   : > { %504 = vmatpush3.bf16.msra.mxu0 %v501_v16  ;;  %529 = vmatpush3.bf16.msra.mxu1 %v501_v16 }
  0x25   : > { %506 = vmatprep.subr.bf16.mxu0 %v505_v19  ;;  %522 = vmatprep.subr.bf16.mxu1 %v505_v19 }
  0x28   : > { %508 = vmatpush3.bf16.msra.mxu0 %v505_v19  ;;  %530 = vmatpush3.bf16.msra.mxu1 %v505_v19 }
  0x29   : > { %510 = vmatprep.subr.bf16.mxu0 %v509_v22  ;;  %523 = vmatprep.subr.bf16.mxu1 %v509_v22 }
  0x2c   : > { %512 = vmatpush3.bf16.msra.mxu0 %v509_v22  ;;  %531 = vmatpush3.bf16.msra.mxu1 %v509_v22 }
  0x2d   : > { %514 = vmatprep.subr.bf16.mxu0 %v513_v25  ;;  %524 = vmatprep.subr.bf16.mxu1 %v513_v25 }
  0x30   : > { %516 = vmatpush3.bf16.msra.mxu0 %v513_v25  ;;  %532 = vmatpush3.bf16.msra.mxu1 %v513_v25 }
  0x33   : > { %480 = vmatmul.mubr.f32.vlgmr.msra.gmra.mrb[0].mxu0 %v185_v26  ;;  %483 = vmatmul.mubr.f32.vlgmr.msra.gmra.mrb[0].mxu1 %v187_v27 }
 0x106   : > { %v481_v28 = vpop.f32.mrb[0].mxu0  ;;  %v484_v29 = vpop.f32.mrb[0].mxu1 }
 0x107   : > { %290 = vst [vmem:[%s178_s29 + $0x8] sm:$0xff] %v481_v28  ;;  %292 = vst [vmem:[%s178_s29 + $0x18] sm:$0xff] %v484_v29  ;;  %299 = vadd.xlane.f32.xlu1 %v484_v29  ;;  %v280_v30 = vpop.f32.mrb[1].mxu1  ;;  %295 = vadd.xlane.f32.xlu0 %v481_v28  ;;  %v270_v31 = vpop.f32.mrb[1].mxu0  ;;  %v302_v32 = vmul.f32 %v481_v28, %v481_v28  ;;  %v304_v34 = vmul.f32 %v484_v29, %v484_v29 }
 0x108   : > { %291 = vst [vmem:[%s178_s29 + $0x10] sm:$0xff] %v280_v30  ;;  %289 = vst [vmem:[%s178_s29] sm:$0xff] %v270_v31  ;;  %v301_v33 = vmul.f32 %v270_v31, %v270_v31  ;;  %v303_v35 = vmul.f32 %v280_v30, %v280_v30 }
 0x10b   : > { %297 = vadd.xlane.f32.xlu1 %v280_v30  ;;  %293 = vadd.xlane.f32.xlu0 %v270_v31 }
 0x10f   : > { %307 = vadd.xlane.f32.xlu1 %v302_v32  ;;  %305 = vadd.xlane.f32.xlu0 %v301_v33 }
 0x113   : > { %311 = vadd.xlane.f32.xlu1 %v304_v34  ;;  %309 = vadd.xlane.f32.xlu0 %v303_v35 }
 0x194   : > { %v300_v36 = vpop.xlane.xlu1 %299  ;;  %v296_v37 = vpop.xlane.xlu0 %295 }
 0x198   : > { %v298_v38 = vpop.xlane.xlu1 %297  ;;  %v294_v39 = vpop.xlane.xlu0 %293 }
 0x19c   : > { %v308_v40 = vpop.xlane.xlu1 %307  ;;  %v306_v41 = vpop.xlane.xlu0 %305 }
 0x19d   : > { %v315_v42 = vsel %vm313_vm0, %v296_v37, %v308_v40  ;;  %v314_v43 = vsel %vm313_vm0, %v294_v39, %v306_v41 }
 0x19e   : > { %320 = vst.msk [vmem:[%s183_s5 + $0x8] sm:$0xff] %vm318_vm1, %v315_v42  ;;  %319 = vst.msk [vmem:[%s183_s5] sm:$0xff] %vm318_vm1, %v314_v43 }
 0x1a0   : > { %v312_v44 = vpop.xlane.xlu1 %311  ;;  %v310_v45 = vpop.xlane.xlu0 %309 }
 0x1a1   : > { %v317_v46 = vsel %vm313_vm0, %v300_v36, %v312_v44  ;;  %v316_v47 = vsel %vm313_vm0, %v298_v38, %v310_v45 }
 0x1a2   : > { %322 = vst.msk [vmem:[%s183_s5 + $0x18] sm:$0xff] %vm318_vm1, %v317_v46  ;;  %321 = vst.msk [vmem:[%s183_s5 + $0x10] sm:$0xff] %vm318_vm1, %v316_v47 }
 0x1a3 PF: > { %s14_s12 = sadd.s32 1, %s547_s12  }
 0x1a4   : > { %p11_p4 = scmp.ge.s32.totalorder %s14_s12, 4  }
 0x1a6   :  { %13 = sbr.rel (!%p11_p4) target bundleno = 1 (0x1), region = 70 }

// kernel: resnet_bottleneck_1d.5
= control target key start
LH: loop header
LB: loop body
LE: loop exit
PB: predicated region body
PF: predicated region fallthrough
CT: control target
= control target key end

     0   :  { %s760_s18 = smov 0   ;;  %s825_s0 = inlined_call_operand.vmem [shape: f32[2,32,128], index: 0, kind: input, shape index: {}]   ;;  %s826_s1 = inlined_call_operand.vmem [shape: f32[32,1], index: 1, kind: input, shape index: {}]   ;;  %s827_s2 = inlined_call_operand.vmem [shape: f32[32,1], index: 2, kind: input, shape index: {}]   ;;  %s828_s3 = inlined_call_operand.vmem [shape: f32[32,96], index: 3, kind: input, shape index: {}]   ;;  %s829_s4 = inlined_call_operand.vmem [shape: f32[2,32,128], index: 4, kind: output, shape index: {0}]   ;;  %s830_s5 = inlined_call_operand.vmem [shape: f32[2,32,2], index: 5, kind: output, shape index: {1}]  }
   0x1 LB: > { %s558_s19 = sadd.s32 4294967295, %s725_s18   ;;  %p562_p0 = scmp.ge.s32.totalorder %s725_s18, 1  ;;  %s725_s18 = sphi %s760_s18, %s16_s18  }
   0x2   : > { %p190_p1 = scmp.lt.s32.totalorder %s725_s18, 3 }
   0x4   : > { %p191_p2 = pnand %p562_p0, %p190_p1 }
   0x5   : > { %v270_v0 = vld [vmem:[%s827_s2] sm:$0xff] (!%p191_p2)  ;;  %v727_v2 = vmov (!%p191_p2), 0   ;;  %v271_v3 = vld [vmem:[%s827_s2 + $0x8] sm:$0xff] (!%p191_p2)  ;;  %v245_v5 = vld [vmem:[%s826_s1 + $0x18] sm:$0xff] (!%p191_p2)  ;;  %p223_p3 = scmp.lt.s32.totalorder (!%p191_p2), %s558_s19, 1  ;;  %s728_s15 = smov (!%p191_p2), 1   ;;  %v302_v39 = vlaneseq (!%p191_p2) }
   0x6   : > { %194 = sbr.rel (%p191_p2) target bundleno = 664 (0x298), region = 36  ;;  %v242_v1 = vld [vmem:[%s826_s1] sm:$0xff] (!%p191_p2)  ;;  %698 = vset.pattern.permute.xlu1 (!%p191_p2), %v727_v2  ;;  %697 = vset.pattern.permute.xlu0 (!%p191_p2), %v727_v2  ;;  %v243_v4 = vld [vmem:[%s826_s1 + $0x8] sm:$0xff] (!%p191_p2)  ;;  %v244_v6 = vld [vmem:[%s826_s1 + $0x10] sm:$0xff] (!%p191_p2)  ;;  %s729_s16 = smov (!%p191_p2), 127   ;;  %vm338_vm0 = vcmask (!%p191_p2), 785408  }
   0x7   : > { %276 = vperm.xlu1 (!%p191_p2), %698, %v270_v0   ;;  %248 = vperm.xlu0 (!%p191_p2), %697, %v242_v1   ;;  %v273_v7 = vld [vmem:[%s827_s2 + $0x18] sm:$0xff] (!%p191_p2)  ;;  %v272_v8 = vld [vmem:[%s827_s2 + $0x10] sm:$0xff] (!%p191_p2)  ;;  %v334_v37 = vld [vmem:[%s828_s3] sm:$0xff] (!%p191_p2)  ;;  %v303_v40 = vand.u32 (!%p191_p2), 127, %v302_v39  ;;  %vm460_vm5 = vcmask (!%p191_p2), 7168   ;;  %vm465_vm6 = vcmask (!%p191_p2), 15360  }
   0x8   : > { %v336_v38 = vld [vmem:[%s828_s3 + $0x10] sm:$0xff] (!%p191_p2)  ;;  %636 = vmatprep.mubr.msk.f32.mxu0 (!%p191_p2), %vm338_vm0, %v334_v37  ;;  %v335_v57 = vld [vmem:[%s828_s3 + $0x8] sm:$0xff] (!%p191_p2)  ;;  %v337_v58 = vld [vmem:[%s828_s3 + $0x18] sm:$0xff] (!%p191_p2) }
   0x9   : > { %639 = vmatprep.mubr.msk.f32.mxu1 (!%p191_p2), %vm338_vm0, %v336_v38  ;;  %vm594_vm1 = vcmp.ne.s32.totalorder (!%p191_p2), %v303_v40, 0  ;;  %vm595_vm3 = vcmp.ne.s32.totalorder (!%p191_p2), %v303_v40, 127 }
   0xa   : > { %vm643_vm2 = vmpackc.low (!%p191_p2), %vm594_vm1, %vm594_vm1 }
   0xb   : > { %281 = vperm.xlu1 (!%p191_p2), %698, %v271_v3   ;;  %253 = vperm.xlu0 (!%p191_p2), %697, %v243_v4   ;;  %vm663_vm4 = vmpackc.low (!%p191_p2), %vm595_vm3, %vm595_vm3 }
   0xd   : > { %s832_s19 = smov (!%p223_p3, %s558_s19), 1 }
   0xe   : > { %s792_s11 = sshll.u32 %s832_s19, 5 }
   0xf   : > { %263 = vperm.xlu1 %698, %v245_v5   ;;  %258 = vperm.xlu0 %697, %v244_v6   ;;  %s227_s14 = scalar_lea.vmem %s825_s0, %s792_s11  ;;  %s232_s28 = scalar_lea.vmem %s829_s4, %s792_s11 }
  0x10   : > { %v238_v9 = vld [vmem:[%s227_s14] sm:$0xff]  ;;  %v239_v13 = vld [vmem:[%s227_s14 + $0x8] sm:$0xff]  ;;  %v241_v20 = vld [vmem:[%s227_s14 + $0x18] sm:$0xff]  ;;  %s237_s6 = scalar_lea.vmem %s830_s5, %s792_s11 }
  0x11   : > { %v240_v22 = vld [vmem:[%s227_s14 + $0x10] sm:$0xff] }
  0x13   : > { %291 = vperm.xlu1 %698, %v273_v7   ;;  %286 = vperm.xlu0 %697, %v272_v8  }
  0x86   : > { %v277_v10 = vpop.permute.xlu1 %276  ;;  %v249_v11 = vpop.permute.xlu0 %248 }
  0x87   : > { %v266_v12 = vmul.f32 %v249_v11, %v238_v9 }
  0x89   : > { %v294_v16 = vadd.f32 %v277_v10, %v266_v12 }
  0x8a   : > { %v282_v14 = vpop.permute.xlu1 %281  ;;  %v254_v15 = vpop.permute.xlu0 %253 }
  0x8b   : > { %v267_v17 = vmul.f32 %v254_v15, %v239_v13  ;;  %v298_v23 = vmax.f32 %v294_v16, 0.0 }
  0x8d   : > { %v295_v18 = vadd.f32 %v282_v14, %v267_v17 }
  0x8e   : > { %v264_v19 = vpop.permute.xlu1 %263  ;;  %v259_v21 = vpop.permute.xlu0 %258 }
  0x8f   : > { %v299_v24 = vmax.f32 %v295_v18, 0.0  ;;  %v269_v25 = vmul.f32 %v264_v19, %v241_v20  ;;  %v268_v26 = vmul.f32 %v259_v21, %v240_v22 }
  0x91   : > { %v699_v27 = vpack.i.bf16 %v299_v24, %v298_v23  ;;  %v654_v28 = vpack.c.bf16 %v299_v24, %v298_v23 }
  0x92   : > { %v292_v29 = vpop.permute.xlu1 %291  ;;  %v287_v30 = vpop.permute.xlu0 %286 }
  0x93   : > { %v297_v31 = vadd.f32 %v292_v29, %v269_v25  ;;  %v296_v32 = vadd.f32 %v287_v30, %v268_v26  ;;  %700 = vrot.lane.b32.xlu0 %v699_v27, %s728_s15 }
  0x95   : > { %v301_v33 = vmax.f32 %v297_v31, 0.0  ;;  %v300_v34 = vmax.f32 %v296_v32, 0.0 }
  0x97   : > { %v658_v35 = vpack.c.bf16 %v301_v33, %v300_v34  ;;  %710 = vrot.lane.b32.xlu0 %v699_v27, %s729_s16  ;;  %v704_v36 = vpack.i.bf16 %v301_v33, %v300_v34 }
  0x99   : > { %705 = vrot.lane.b32.xlu1 %v704_v36, %s728_s15 }
  0x9d   : > { %715 = vrot.lane.b32.xlu1 %v704_v36, %s729_s16 }
 0x105   : > { %v701_v41 = vpop.permute.xlu0 %700 }
 0x106   : > { %v703_v42 = vunpack.i.h.bf16 %v701_v41  ;;  %v702_v43 = vunpack.i.l.bf16 %v701_v41 }
 0x108   : > { %v642_v44 = vpack.c.bf16 %v703_v42, %v702_v43 }
 0x109   : > { %v711_v49 = vpop.permute.xlu0 %710 }
 0x10a   : > { %644 = vmatprep.subr.msk.bf16.mxu0 %vm643_vm2, %v642_v44  ;;  %674 = vmatprep.subr.msk.bf16.mxu1 %vm643_vm2, %v642_v44  ;;  %v713_v50 = vunpack.i.h.bf16 %v711_v49  ;;  %v712_v51 = vunpack.i.l.bf16 %v711_v49 }
 0x10b   : > { %v706_v45 = vpop.permute.xlu1 %705  ;;  %647 = vmatpush3.bf16.msk.msra.mxu0 %vm643_vm2, %v642_v44  ;;  %680 = vmatpush3.bf16.msk.msra.mxu1 %vm643_vm2, %v642_v44 }
 0x10c   : > { %v708_v46 = vunpack.i.h.bf16 %v706_v45  ;;  %v707_v47 = vunpack.i.l.bf16 %v706_v45  ;;  %v662_v53 = vpack.c.bf16 %v713_v50, %v712_v51 }
 0x10e   : > { %v648_v48 = vpack.c.bf16 %v708_v46, %v707_v47 }
 0x10f   : > { %v716_v52 = vpop.permute.xlu1 %715 }
 0x110   : > { %650 = vmatprep.subr.msk.bf16.mxu0 %vm643_vm2, %v648_v48  ;;  %675 = vmatprep.subr.msk.bf16.mxu1 %vm643_vm2, %v648_v48  ;;  %v718_v54 = vunpack.i.h.bf16 %v716_v52  ;;  %v717_v55 = vunpack.i.l.bf16 %v716_v52 }
 0x111   : > { %653 = vmatpush3.bf16.msk.msra.mxu0 %vm643_vm2, %v648_v48  ;;  %681 = vmatpush3.bf16.msk.msra.mxu1 %vm643_vm2, %v648_v48 }
 0x112   : > { %655 = vmatprep.subr.bf16.mxu0 %v654_v28  ;;  %676 = vmatprep.subr.bf16.mxu1 %v654_v28  ;;  %v668_v56 = vpack.c.bf16 %v718_v54, %v717_v55 }
 0x115   : > { %657 = vmatpush3.bf16.msra.mxu0 %v654_v28  ;;  %682 = vmatpush3.bf16.msra.mxu1 %v654_v28 }
 0x116   : > { %659 = vmatprep.subr.bf16.mxu0 %v658_v35  ;;  %677 = vmatprep.subr.bf16.mxu1 %v658_v35 }
 0x119   : > { %661 = vmatpush3.bf16.msra.mxu0 %v658_v35  ;;  %683 = vmatpush3.bf16.msra.mxu1 %v658_v35 }
 0x11a   : > { %664 = vmatprep.subr.msk.bf16.mxu0 %vm663_vm4, %v662_v53  ;;  %678 = vmatprep.subr.msk.bf16.mxu1 %vm663_vm4, %v662_v53 }
 0x11d   : > { %667 = vmatpush3.bf16.msk.msra.mxu0 %vm663_vm4, %v662_v53  ;;  %684 = vmatpush3.bf16.msk.msra.mxu1 %vm663_vm4, %v662_v53 }
 0x11e   : > { %670 = vmatprep.subr.msk.bf16.mxu0 %vm663_vm4, %v668_v56  ;;  %679 = vmatprep.subr.msk.bf16.mxu1 %vm663_vm4, %v668_v56 }
 0x121   : > { %673 = vmatpush3.bf16.msk.msra.mxu0 %vm663_vm4, %v668_v56  ;;  %685 = vmatpush3.bf16.msk.msra.mxu1 %vm663_vm4, %v668_v56 }
 0x124   : > { %637 = vmatmul.mubr.msk.f32.vlgmr.msra.gmra.mrb[0].mxu0 %vm338_vm0, %v335_v57  ;;  %640 = vmatmul.mubr.msk.f32.vlgmr.msra.gmra.mrb[0].mxu1 %vm338_vm0, %v337_v58 }
 0x1f7   : > { %v638_v59 = vpop.f32.mrb[0].mxu0  ;;  %v641_v60 = vpop.f32.mrb[0].mxu1 }
 0x1f8   : > { %437 = vst [vmem:[%s232_s28 + $0x8] sm:$0xff] %v638_v59  ;;  %439 = vst [vmem:[%s232_s28 + $0x18] sm:$0xff] %v641_v60  ;;  %446 = vadd.xlane.f32.xlu0 %v641_v60  ;;  %v427_v61 = vpop.f32.mrb[1].mxu1  ;;  %442 = vadd.xlane.f32.xlu1 %v638_v59  ;;  %v417_v62 = vpop.f32.mrb[1].mxu0  ;;  %v449_v1 = vmul.f32 %v638_v59, %v638_v59  ;;  %v451_v2 = vmul.f32 %v641_v60, %v641_v60 }
 0x1f9   : > { %438 = vst [vmem:[%s232_s28 + $0x10] sm:$0xff] %v427_v61  ;;  %436 = vst [vmem:[%s232_s28] sm:$0xff] %v417_v62  ;;  %v448_v63 = vmul.f32 %v417_v62, %v417_v62  ;;  %v450_v0 = vmul.f32 %v427_v61, %v427_v61 }
 0x1fc   : > { %440 = vadd.xlane.f32.xlu0 %v417_v62  ;;  %452 = vadd.xlane.f32.xlu1 %v448_v63 }
 0x200   : > { %444 = vadd.xlane.f32.xlu0 %v427_v61  ;;  %456 = vadd.xlane.f32.xlu1 %v450_v0 }
 0x204   : > { %454 = vadd.xlane.f32.xlu0 %v449_v1 }
 0x208   : > { %458 = vadd.xlane.f32.xlu0 %v451_v2 }
 0x285   : > { %v447_v3 = vpop.xlane.xlu0 %446  ;;  %v443_v4 = vpop.xlane.xlu1 %442 }
 0x289   : > { %v441_v5 = vpop.xlane.xlu0 %440  ;;  %v453_v6 = vpop.xlane.xlu1 %452 }
 0x28a   : > { %v461_v7 = vsel %vm460_vm5, %v441_v5, %v453_v6 }
 0x28b   : > { %466 = vst.msk [vmem:[%s237_s6] sm:$0xff] %vm465_vm6, %v461_v7 }
 0x28d   : > { %v445_v8 = vpop.xlane.xlu0 %444  ;;  %v457_v9 = vpop.xlane.xlu1 %456 }
 0x28e   : > { %v463_v10 = vsel %vm460_vm5, %v445_v8, %v457_v9 }
 0x28f   : > { %468 = vst.msk [vmem:[%s237_s6 + $0x10] sm:$0xff] %vm465_vm6, %v463_v10 }
 0x291   : > { %v455_v11 = vpop.xlane.xlu0 %454 }
 0x292   : > { %v462_v12 = vsel %vm460_vm5, %v443_v4, %v455_v11 }
 0x293   : > { %467 = vst.msk [vmem:[%s237_s6 + $0x8] sm:$0xff] %vm465_vm6, %v462_v12 }
 0x295   : > { %v459_v13 = vpop.xlane.xlu0 %458 }
 0x296   : > { %v464_v14 = vsel %vm460_vm5, %v447_v3, %v459_v13 }
 0x297   : > { %469 = vst.msk [vmem:[%s237_s6 + $0x18] sm:$0xff] %vm465_vm6, %v464_v14 }
 0x298 PF: > { %s16_s18 = sadd.s32 1, %s725_s18  }
 0x299   : > { %p13_p4 = scmp.ge.s32.totalorder %s16_s18, 4  }
 0x29b   :  { %15 = sbr.rel (!%p13_p4) target bundleno = 1 (0x1), region = 78 }

// kernel: resnet_bottleneck_1d.6
= control target key start
LH: loop header
LB: loop body
LE: loop exit
PB: predicated region body
PF: predicated region fallthrough
CT: control target
= control target key end

     0   :  { %s876_s18 = smov 0   ;;  %s1064_s0 = inlined_call_operand.vmem [shape: f32[2,32,128], index: 0, kind: input, shape index: {}]   ;;  %s1065_s1 = inlined_call_operand.vmem [shape: f32[32,1], index: 1, kind: input, shape index: {}]   ;;  %s1066_s2 = inlined_call_operand.vmem [shape: f32[32,1], index: 2, kind: input, shape index: {}]   ;;  %s1067_s3 = inlined_call_operand.vmem [shape: f32[128,32], index: 3, kind: input, shape index: {}]   ;;  %s1068_s4 = inlined_call_operand.vmem [shape: f32[2,128,128], index: 4, kind: output, shape index: {0}]   ;;  %s1069_s5 = inlined_call_operand.vmem [shape: f32[2,128,2], index: 5, kind: output, shape index: {1}]  }
   0x1 LB: > { %s730_s19 = sadd.s32 4294967295, %s843_s18   ;;  %p734_p0 = scmp.ge.s32.totalorder %s843_s18, 1  ;;  %s843_s18 = sphi %s876_s18, %s16_s18  }
   0x2   : > { %p190_p1 = scmp.lt.s32.totalorder %s843_s18, 3 }
   0x4   : > { %p191_p2 = pnand %p734_p0, %p190_p1 }
   0x5   : > { %v270_v0 = vld [vmem:[%s1066_s2] sm:$0xff] (!%p191_p2)  ;;  %v845_v2 = vmov (!%p191_p2), 0   ;;  %v271_v3 = vld [vmem:[%s1066_s2 + $0x8] sm:$0xff] (!%p191_p2)  ;;  %v245_v5 = vld [vmem:[%s1065_s1 + $0x18] sm:$0xff] (!%p191_p2)  ;;  %vm318_vm0 = vcmask (!%p191_p2), 261120   ;;  %p223_p3 = scmp.lt.s32.totalorder (!%p191_p2), %s730_s19, 1 }
   0x6   : > { %194 = sbr.rel (%p191_p2) target bundleno = 577 (0x241), region = 36  ;;  %v242_v1 = vld [vmem:[%s1065_s1] sm:$0xff] (!%p191_p2)  ;;  %836 = vset.pattern.permute.xlu1 (!%p191_p2), %v845_v2  ;;  %835 = vset.pattern.permute.xlu0 (!%p191_p2), %v845_v2  ;;  %v243_v4 = vld [vmem:[%s1065_s1 + $0x8] sm:$0xff] (!%p191_p2)  ;;  %v244_v6 = vld [vmem:[%s1065_s1 + $0x10] sm:$0xff] (!%p191_p2)  ;;  %vm608_vm1 = vcmask (!%p191_p2), 7168   ;;  %vm625_vm2 = vcmask (!%p191_p2), 15360  }
   0x7   : > { %276 = vperm.xlu1 (!%p191_p2), %836, %v270_v0   ;;  %248 = vperm.xlu0 (!%p191_p2), %835, %v242_v1   ;;  %v273_v7 = vld [vmem:[%s1066_s2 + $0x18] sm:$0xff] (!%p191_p2)  ;;  %v272_v8 = vld [vmem:[%s1066_s2 + $0x10] sm:$0xff] (!%p191_p2)  ;;  %v302_v9 = vld [vmem:[%s1067_s3] sm:$0xff] (!%p191_p2) }
   0x8   : > { %v310_v10 = vld [vmem:[%s1067_s3 + $0x40] sm:$0xff] (!%p191_p2)  ;;  %790 = vmatprep.mubr.msk.f32.mxu0 (!%p191_p2), %vm318_vm0, %v302_v9  ;;  %v303_v37 = vld [vmem:[%s1067_s3 + $0x8] sm:$0xff] (!%p191_p2)  ;;  %v304_v39 = vld [vmem:[%s1067_s3 + $0x10] sm:$0xff] (!%p191_p2) }
   0x9   : > { %802 = vmatprep.mubr.msk.f32.mxu1 (!%p191_p2), %vm318_vm0, %v310_v10  ;;  %v311_v38 = vld [vmem:[%s1067_s3 + $0x48] sm:$0xff] (!%p191_p2)  ;;  %v312_v40 = vld [vmem:[%s1067_s3 + $0x50] sm:$0xff] (!%p191_p2)  ;;  %v305_v41 = vld [vmem:[%s1067_s3 + $0x18] sm:$0xff] (!%p191_p2) }
   0xa   : > { %v313_v42 = vld [vmem:[%s1067_s3 + $0x58] sm:$0xff] (!%p191_p2)  ;;  %v306_v43 = vld [vmem:[%s1067_s3 + $0x20] sm:$0xff] (!%p191_p2)  ;;  %v307_v45 = vld [vmem:[%s1067_s3 + $0x28] sm:$0xff] (!%p191_p2) }
   0xb   : > { %281 = vperm.xlu1 (!%p191_p2), %836, %v271_v3   ;;  %253 = vperm.xlu0 (!%p191_p2), %835, %v243_v4   ;;  %v314_v44 = vld [vmem:[%s1067_s3 + $0x60] sm:$0xff] (!%p191_p2)  ;;  %v315_v46 = vld [vmem:[%s1067_s3 + $0x68] sm:$0xff] (!%p191_p2)  ;;  %v308_v47 = vld [vmem:[%s1067_s3 + $0x30] sm:$0xff] (!%p191_p2) }
   0xc   : > { %v316_v48 = vld [vmem:[%s1067_s3 + $0x70] sm:$0xff] (!%p191_p2)  ;;  %v309_v49 = vld [vmem:[%s1067_s3 + $0x38] sm:$0xff] (!%p191_p2) }
   0xd   : > { %s1071_s19 = smov (!%p223_p3, %s730_s19), 1  ;;  %v317_v50 = vld [vmem:[%s1067_s3 + $0x78] sm:$0xff] }
   0xe   : > { %s759_s15 = sshll.u32 %s1071_s19, 5  ;;  %s760_s26 = sshll.u32 %s1071_s19, 7 }
   0xf   : > { %263 = vperm.xlu1 %836, %v245_v5   ;;  %258 = vperm.xlu0 %835, %v244_v6   ;;  %s227_s20 = scalar_lea.vmem %s1064_s0, %s759_s15  ;;  %s988_s29 = scalar_lea.vmem %s1068_s4, %s760_s26 }
  0x10   : > { %v238_v11 = vld [vmem:[%s227_s20] sm:$0xff]  ;;  %v239_v15 = vld [vmem:[%s227_s20 + $0x8] sm:$0xff]  ;;  %v241_v22 = vld [vmem:[%s227_s20 + $0x18] sm:$0xff]  ;;  %s1011_s7 = scalar_lea.vmem %s1069_s5, %s760_s26 }
  0x11   : > { %v240_v24 = vld [vmem:[%s227_s20 + $0x10] sm:$0xff] }
  0x13   : > { %291 = vperm.xlu1 %836, %v273_v7   ;;  %286 = vperm.xlu0 %835, %v272_v8  }
  0x86   : > { %v277_v12 = vpop.permute.xlu1 %276  ;;  %v249_v13 = vpop.permute.xlu0 %248 }
  0x87   : > { %v266_v14 = vmul.f32 %v249_v13, %v238_v11 }
  0x89   : > { %v294_v18 = vadd.f32 %v277_v12, %v266_v14 }
  0x8a   : > { %v282_v16 = vpop.permute.xlu1 %281  ;;  %v254_v17 = vpop.permute.xlu0 %253 }
  0x8b   : > { %v267_v19 = vmul.f32 %v254_v17, %v239_v15  ;;  %v298_v25 = vmax.f32 %v294_v18, 0.0 }
  0x8d   : > { %v295_v20 = vadd.f32 %v282_v16, %v267_v19 }
  0x8e   : > { %v264_v21 = vpop.permute.xlu1 %263  ;;  %v259_v23 = vpop.permute.xlu0 %258 }
  0x8f   : > { %v299_v26 = vmax.f32 %v295_v20, 0.0  ;;  %v269_v28 = vmul.f32 %v264_v21, %v241_v22  ;;  %v268_v29 = vmul.f32 %v259_v23, %v240_v24 }
  0x91   : > { %v814_v27 = vpack.c.bf16 %v299_v26, %v298_v25 }
  0x92   : > { %v292_v30 = vpop.permute.xlu1 %291  ;;  %v287_v31 = vpop.permute.xlu0 %286 }
  0x93   : > { %v297_v32 = vadd.f32 %v292_v30, %v269_v28  ;;  %v296_v33 = vadd.f32 %v287_v31, %v268_v29  ;;  %815 = vmatprep.subr.bf16.mxu0 %v814_v27  ;;  %822 = vmatprep.subr.bf16.mxu1 %v814_v27 }
  0x94   : > { %817 = vmatpush3.bf16.msra.mxu0 %v814_v27  ;;  %824 = vmatpush3.bf16.msra.mxu1 %v814_v27 }
  0x95   : > { %v301_v34 = vmax.f32 %v297_v32, 0.0  ;;  %v300_v35 = vmax.f32 %v296_v33, 0.0 }
  0x97   : > { %v818_v36 = vpack.c.bf16 %v301_v34, %v300_v35 }
  0x99   : > { %819 = vmatprep.subr.bf16.mxu0 %v818_v36  ;;  %823 = vmatprep.subr.bf16.mxu1 %v818_v36 }
  0x9a   : > { %821 = vmatpush3.bf16.msra.mxu0 %v818_v36  ;;  %825 = vmatpush3.bf16.msra.mxu1 %v818_v36 }
  0x9d   : > { %791 = vmatmul.mubr.msk.f32.vlgmr.msra.gmra.mrb[0].mxu0 %vm318_vm0, %v303_v37  ;;  %803 = vmatmul.mubr.msk.f32.vlgmr.msra.gmra.mrb[0].mxu1 %vm318_vm0, %v311_v38 }
  0x9e   : > { %793 = vmatprep.mubr.msk.f32.mxu0 %vm318_vm0, %v304_v39  ;;  %805 = vmatprep.mubr.msk.f32.mxu1 %vm318_vm0, %v312_v40 }
  0xa1   : > { %794 = vmatmul.mubr.msk.f32.gmra.mrb[2].mxu0 %vm318_vm0, %v305_v41  ;;  %806 = vmatmul.mubr.msk.f32.gmra.mrb[2].mxu1 %vm318_vm0, %v313_v42 }
  0xa2   : > { %796 = vmatprep.mubr.msk.f32.mxu0 %vm318_vm0, %v306_v43  ;;  %808 = vmatprep.mubr.msk.f32.mxu1 %vm318_vm0, %v314_v44 }
  0xa5   : > { %797 = vmatmul.mubr.msk.f32.gmra.mrb[4].mxu0 %vm318_vm0, %v307_v45  ;;  %809 = vmatmul.mubr.msk.f32.gmra.mrb[4].mxu1 %vm318_vm0, %v315_v46 }
  0xa6   : > { %799 = vmatprep.mubr.msk.f32.mxu0 %vm318_vm0, %v308_v47  ;;  %811 = vmatprep.mubr.msk.f32.mxu1 %vm318_vm0, %v316_v48 }
  0xa9   : > { %800 = vmatmul.mubr.msk.f32.gmra.mrb[6].mxu0 %vm318_vm0, %v309_v49  ;;  %812 = vmatmul.mubr.msk.f32.gmra.mrb[6].mxu1 %vm318_vm0, %v317_v50 }
 0x170   : > { %v792_v51 = vpop.f32.mrb[0].mxu0  ;;  %v804_v52 = vpop.f32.mrb[0].mxu1 }
 0x171   : > { %513 = vst [vmem:[%s988_s29 + $0x8] sm:$0xff] %v792_v51  ;;  %521 = vst [vmem:[%s988_s29 + $0x48] sm:$0xff] %v804_v52  ;;  %546 = vadd.xlane.f32.xlu0 %v804_v52  ;;  %v473_v53 = vpop.f32.mrb[1].mxu1  ;;  %530 = vadd.xlane.f32.xlu1 %v792_v51  ;;  %v433_v54 = vpop.f32.mrb[1].mxu0  ;;  %v561_v59 = vmul.f32 %v792_v51, %v792_v51  ;;  %v569_v1 = vmul.f32 %v804_v52, %v804_v52 }
 0x172   : > { %520 = vst [vmem:[%s988_s29 + $0x40] sm:$0xff] %v473_v53  ;;  %512 = vst [vmem:[%s988_s29] sm:$0xff] %v433_v54  ;;  %v560_v60 = vmul.f32 %v433_v54, %v433_v54  ;;  %v568_v2 = vmul.f32 %v473_v53, %v473_v53 }
 0x174   : > { %v795_v55 = vpop.f32.mrb[2].mxu0  ;;  %v807_v56 = vpop.f32.mrb[2].mxu1 }
 0x175   : > { %544 = vadd.xlane.f32.xlu1 %v473_v53  ;;  %528 = vadd.xlane.f32.xlu0 %v433_v54  ;;  %515 = vst [vmem:[%s988_s29 + $0x18] sm:$0xff] %v795_v55  ;;  %523 = vst [vmem:[%s988_s29 + $0x58] sm:$0xff] %v807_v56  ;;  %v443_v57 = vpop.f32.mrb[3].mxu0  ;;  %v483_v58 = vpop.f32.mrb[3].mxu1  ;;  %v563_v9 = vmul.f32 %v795_v55, %v795_v55  ;;  %v571_v10 = vmul.f32 %v807_v56, %v807_v56 }
 0x176   : > { %514 = vst [vmem:[%s988_s29 + $0x10] sm:$0xff] %v443_v57  ;;  %522 = vst [vmem:[%s988_s29 + $0x50] sm:$0xff] %v483_v58  ;;  %v562_v7 = vmul.f32 %v443_v57, %v443_v57  ;;  %v570_v8 = vmul.f32 %v483_v58, %v483_v58 }
 0x178   : > { %v798_v61 = vpop.f32.mrb[4].mxu0  ;;  %v810_v62 = vpop.f32.mrb[4].mxu1 }
 0x179   : > { %578 = vadd.xlane.f32.xlu0 %v561_v59  ;;  %576 = vadd.xlane.f32.xlu1 %v560_v60  ;;  %517 = vst [vmem:[%s988_s29 + $0x28] sm:$0xff] %v798_v61  ;;  %v453_v63 = vpop.f32.mrb[5].mxu0  ;;  %525 = vst [vmem:[%s988_s29 + $0x68] sm:$0xff] %v810_v62  ;;  %v493_v0 = vpop.f32.mrb[5].mxu1  ;;  %v565_v13 = vmul.f32 %v798_v61, %v798_v61  ;;  %v573_v14 = vmul.f32 %v810_v62, %v810_v62 }
 0x17a   : > { %516 = vst [vmem:[%s988_s29 + $0x20] sm:$0xff] %v453_v63  ;;  %524 = vst [vmem:[%s988_s29 + $0x60] sm:$0xff] %v493_v0  ;;  %v564_v11 = vmul.f32 %v453_v63, %v453_v63  ;;  %v572_v12 = vmul.f32 %v493_v0, %v493_v0 }
 0x17c   : > { %v801_v3 = vpop.f32.mrb[6].mxu0  ;;  %v813_v4 = vpop.f32.mrb[6].mxu1 }
 0x17d   : > { %594 = vadd.xlane.f32.xlu0 %v569_v1  ;;  %592 = vadd.xlane.f32.xlu1 %v568_v2  ;;  %519 = vst [vmem:[%s988_s29 + $0x38] sm:$0xff] %v801_v3  ;;  %v463_v5 = vpop.f32.mrb[7].mxu0  ;;  %527 = vst [vmem:[%s988_s29 + $0x78] sm:$0xff] %v813_v4  ;;  %v503_v6 = vpop.f32.mrb[7].mxu1  ;;  %v567_v17 = vmul.f32 %v801_v3, %v801_v3  ;;  %v575_v18 = vmul.f32 %v813_v4, %v813_v4 }
 0x17e   : > { %518 = vst [vmem:[%s988_s29 + $0x30] sm:$0xff] %v463_v5  ;;  %526 = vst [vmem:[%s988_s29 + $0x70] sm:$0xff] %v503_v6  ;;  %v566_v15 = vmul.f32 %v463_v5, %v463_v5  ;;  %v574_v16 = vmul.f32 %v503_v6, %v503_v6 }
 0x181   : > { %548 = vadd.xlane.f32.xlu1 %v483_v58  ;;  %534 = vadd.xlane.f32.xlu0 %v795_v55 }
 0x185   : > { %550 = vadd.xlane.f32.xlu0 %v807_v56  ;;  %580 = vadd.xlane.f32.xlu1 %v562_v7 }
 0x189   : > { %532 = vadd.xlane.f32.xlu0 %v443_v57  ;;  %596 = vadd.xlane.f32.xlu1 %v570_v8 }
 0x18d   : > { %582 = vadd.xlane.f32.xlu0 %v563_v9  ;;  %536 = vadd.xlane.f32.xlu1 %v453_v63 }
 0x191   : > { %598 = vadd.xlane.f32.xlu0 %v571_v10  ;;  %552 = vadd.xlane.f32.xlu1 %v493_v0 }
 0x195   : > { %538 = vadd.xlane.f32.xlu0 %v798_v61  ;;  %584 = vadd.xlane.f32.xlu1 %v564_v11 }
 0x199   : > { %554 = vadd.xlane.f32.xlu0 %v810_v62  ;;  %600 = vadd.xlane.f32.xlu1 %v572_v12 }
 0x19d   : > { %586 = vadd.xlane.f32.xlu0 %v565_v13  ;;  %540 = vadd.xlane.f32.xlu1 %v463_v5 }
 0x1a1   : > { %602 = vadd.xlane.f32.xlu0 %v573_v14  ;;  %556 = vadd.xlane.f32.xlu1 %v503_v6 }
 0x1a5   : > { %542 = vadd.xlane.f32.xlu0 %v801_v3  ;;  %588 = vadd.xlane.f32.xlu1 %v566_v15 }
 0x1a9   : > { %558 = vadd.xlane.f32.xlu0 %v813_v4  ;;  %604 = vadd.xlane.f32.xlu1 %v574_v16 }
 0x1ad   : > { %590 = vadd.xlane.f32.xlu0 %v567_v17 }
 0x1b1   : > { %606 = vadd.xlane.f32.xlu0 %v575_v18 }
 0x1fe   : > { %v547_v19 = vpop.xlane.xlu0 %546  ;;  %v531_v20 = vpop.xlane.xlu1 %530 }
 0x202   : > { %v545_v21 = vpop.xlane.xlu1 %544  ;;  %v529_v22 = vpop.xlane.xlu0 %528 }
 0x206   : > { %v579_v23 = vpop.xlane.xlu0 %578  ;;  %v577_v24 = vpop.xlane.xlu1 %576 }
 0x207   : > { %v610_v25 = vsel %vm608_vm1, %v531_v20, %v579_v23  ;;  %v609_v26 = vsel %vm608_vm1, %v529_v22, %v577_v24 }
 0x208   : > { %627 = vst.msk [vmem:[%s1011_s7 + $0x8] sm:$0xff] %vm625_vm2, %v610_v25  ;;  %626 = vst.msk [vmem:[%s1011_s7] sm:$0xff] %vm625_vm2, %v609_v26 }
 0x20a   : > { %v595_v27 = vpop.xlane.xlu0 %594  ;;  %v593_v28 = vpop.xlane.xlu1 %592 }
 0x20b   : > { %v618_v29 = vsel %vm608_vm1, %v547_v19, %v595_v27  ;;  %v617_v30 = vsel %vm608_vm1, %v545_v21, %v593_v28 }
 0x20c   : > { %635 = vst.msk [vmem:[%s1011_s7 + $0x48] sm:$0xff] %vm625_vm2, %v618_v29  ;;  %634 = vst.msk [vmem:[%s1011_s7 + $0x40] sm:$0xff] %vm625_vm2, %v617_v30 }
 0x20e   : > { %v549_v31 = vpop.xlane.xlu1 %548  ;;  %v535_v32 = vpop.xlane.xlu0 %534 }
 0x212   : > { %v551_v33 = vpop.xlane.xlu0 %550  ;;  %v581_v34 = vpop.xlane.xlu1 %580 }
 0x216   : > { %v533_v35 = vpop.xlane.xlu0 %532  ;;  %v597_v36 = vpop.xlane.xlu1 %596 }
 0x217   : > { %v611_v37 = vsel %vm608_vm1, %v533_v35, %v581_v34  ;;  %v619_v38 = vsel %vm608_vm1, %v549_v31, %v597_v36 }
 0x218   : > { %628 = vst.msk [vmem:[%s1011_s7 + $0x10] sm:$0xff] %vm625_vm2, %v611_v37  ;;  %636 = vst.msk [vmem:[%s1011_s7 + $0x50] sm:$0xff] %vm625_vm2, %v619_v38 }
 0x21a   : > { %v583_v39 = vpop.xlane.xlu0 %582  ;;  %v537_v40 = vpop.xlane.xlu1 %536 }
 0x21b   : > { %v612_v41 = vsel %vm608_vm1, %v535_v32, %v583_v39 }
 0x21c   : > { %629 = vst.msk [vmem:[%s1011_s7 + $0x18] sm:$0xff] %vm625_vm2, %v612_v41 }
 0x21e   : > { %v599_v42 = vpop.xlane.xlu0 %598  ;;  %v553_v43 = vpop.xlane.xlu1 %552 }
 0x21f   : > { %v620_v44 = vsel %vm608_vm1, %v551_v33, %v599_v42 }
 0x220   : > { %637 = vst.msk [vmem:[%s1011_s7 + $0x58] sm:$0xff] %vm625_vm2, %v620_v44 }
 0x222   : > { %v539_v45 = vpop.xlane.xlu0 %538  ;;  %v585_v46 = vpop.xlane.xlu1 %584 }
 0x223   : > { %v613_v47 = vsel %vm608_vm1, %v537_v40, %v585_v46 }
 0x224   : > { %630 = vst.msk [vmem:[%s1011_s7 + $0x20] sm:$0xff] %vm625_vm2, %v613_v47 }
 0x226   : > { %v555_v48 = vpop.xlane.xlu0 %554  ;;  %v601_v49 = vpop.xlane.xlu1 %600 }
 0x227   : > { %v621_v50 = vsel %vm608_vm1, %v553_v43, %v601_v49 }
 0x228   : > { %638 = vst.msk [vmem:[%s1011_s7 + $0x60] sm:$0xff] %vm625_vm2, %v621_v50 }
 0x22a   : > { %v587_v51 = vpop.xlane.xlu0 %586  ;;  %v541_v52 = vpop.xlane.xlu1 %540 }
 0x22b   : > { %v614_v53 = vsel %vm608_vm1, %v539_v45, %v587_v51 }
 0x22c   : > { %631 = vst.msk [vmem:[%s1011_s7 + $0x28] sm:$0xff] %vm625_vm2, %v614_v53 }
 0x22e   : > { %v603_v54 = vpop.xlane.xlu0 %602  ;;  %v557_v55 = vpop.xlane.xlu1 %556 }
 0x22f   : > { %v622_v56 = vsel %vm608_vm1, %v555_v48, %v603_v54 }
 0x230   : > { %639 = vst.msk [vmem:[%s1011_s7 + $0x68] sm:$0xff] %vm625_vm2, %v622_v56 }
 0x232   : > { %v543_v57 = vpop.xlane.xlu0 %542  ;;  %v589_v58 = vpop.xlane.xlu1 %588 }
 0x233   : > { %v615_v59 = vsel %vm608_vm1, %v541_v52, %v589_v58 }
 0x234   : > { %632 = vst.msk [vmem:[%s1011_s7 + $0x30] sm:$0xff] %vm625_vm2, %v615_v59 }
 0x236   : > { %v559_v60 = vpop.xlane.xlu0 %558  ;;  %v605_v61 = vpop.xlane.xlu1 %604 }
 0x237   : > { %v623_v62 = vsel %vm608_vm1, %v557_v55, %v605_v61 }
 0x238   : > { %640 = vst.msk [vmem:[%s1011_s7 + $0x70] sm:$0xff] %vm625_vm2, %v623_v62 }
 0x23a   : > { %v591_v63 = vpop.xlane.xlu0 %590 }
 0x23b   : > { %v616_v0 = vsel %vm608_vm1, %v543_v57, %v591_v63 }
 0x23c   : > { %633 = vst.msk [vmem:[%s1011_s7 + $0x38] sm:$0xff] %vm625_vm2, %v616_v0 }
 0x23e   : > { %v607_v1 = vpop.xlane.xlu0 %606 }
 0x23f   : > { %v624_v2 = vsel %vm608_vm1, %v559_v60, %v607_v1 }
 0x240   : > { %641 = vst.msk [vmem:[%s1011_s7 + $0x78] sm:$0xff] %vm625_vm2, %v624_v2 }
 0x241 PF: > { %s16_s18 = sadd.s32 1, %s843_s18  }
 0x242   : > { %p13_p4 = scmp.ge.s32.totalorder %s16_s18, 4  }
 0x244   :  { %15 = sbr.rel (!%p13_p4) target bundleno = 1 (0x1), region = 78 }

// kernel: resnet_bottleneck_1d.7
= control target key start
LH: loop header
LB: loop body
LE: loop exit
PB: predicated region body
PF: predicated region fallthrough
CT: control target
= control target key end

     0   :  { %9 = vsyncpa [#allocation3], 0  ;;  %s1047_s0 = inlined_call_operand.vmem [shape: f32[2,128,128], index: 0, kind: input, shape index: {}]   ;;  %s1048_s1 = inlined_call_operand.vmem [shape: f32[2,128,128], index: 1, kind: input, shape index: {}]   ;;  %s1049_s2 = inlined_call_operand.vmem [shape: f32[128,1], index: 2, kind: input, shape index: {}]   ;;  %s1050_s3 = inlined_call_operand.vmem [shape: f32[128,1], index: 3, kind: input, shape index: {}]   ;;  %s1051_s4 = inlined_call_operand.hbm [shape: f32[2,128,128], index: 4, kind: output, shape index: {}]  }
   0x1   :  { %11 = vsyncpa [#allocation3 + $0x1], 0  ;;  %s762_s15 = smov 0   ;;  %s764_s16 = smov 0  }
   0x2   :  { %s766_s17 = smov 0   ;;  %s768_s18 = smov 0  }
   0x3 LB: > { %s783_s19 = sadd.s32 4294967295, %s731_s18   ;;  %s608_s20 = sadd.s32 4294967294, %s731_s18   ;;  %s731_s18 = sphi %s768_s18, %s1057_s18   ;;  %s727_s17 = sphi %s766_s17, %s1056_s17   ;;  %s723_s16 = sphi %s764_s16, %s1055_s16   ;;  %s719_s15 = sphi %s762_s15, %s1054_s15  }
   0x4   : > { %s787_s21 = sadd.s32 1, %s731_s18   ;;  %s118_s22 = sadd.s32 1, %s727_s17 }
   0x5   : > { %s115_s23 = ssub.s32 %s731_s18, %s787_s21  ;;  %p128_p0 = scmp.ne.s32.totalorder %s727_s17, %s723_s16 }
   0x6   : > { %p116_p1 = scmp.eq.s32.totalorder %s115_s23, 0  ;;  %p129_p2 = scmp.eq.s32.totalorder %s783_s19, 1 }
   0x7   : > { %p134_p3 = scmp.ne.s32.totalorder %s723_s16, %s719_s15  ;;  %p135_p4 = scmp.eq.s32.totalorder %s608_s20, 1 }
   0x8   : > { %s798_s24 = scalar_select %p116_p1, %s727_s17, %s118_s22  }
   0x9   : > { %p800_p5 = por %p129_p2, %p128_p0  ;;  %p804_p6 = por %p135_p4, %p134_p3 }
   0xa   : > { %p611_p7 = scmp.ge.s32.totalorder %s731_s18, 1  ;;  %p175_p8 = scmp.lt.s32.totalorder %s731_s18, 3 }
   0xc   : > { %p176_p9 = pnand %p611_p7, %p175_p8 }
   0xd   : > { %v234_v0 = vld [vmem:[%s1049_s2 + $0x10] sm:$0xff] (!%p176_p9)  ;;  %v232_v1 = vld [vmem:[%s1049_s2] sm:$0xff] (!%p176_p9)  ;;  %v733_v2 = vmov (!%p176_p9), 0   ;;  %v235_v3 = vld [vmem:[%s1049_s2 + $0x18] sm:$0xff] (!%p176_p9)  ;;  %p206_p10 = scmp.lt.s32.totalorder (!%p176_p9), %s783_s19, 1  ;;  %s203_s5 = sand.u32 (!%p176_p9), 1, %s723_s16  }
   0xe   : > { %179 = sbr.rel (%p176_p9) target bundleno = 224 (0xe0), region = 36  ;;  %668 = vset.pattern.permute.xlu1 (!%p176_p9), %v733_v2  ;;  %667 = vset.pattern.permute.xlu0 (!%p176_p9), %v733_v2  ;;  %v233_v4 = vld [vmem:[%s1049_s2 + $0x8] sm:$0xff] (!%p176_p9)  ;;  %v236_v6 = vld [vmem:[%s1049_s2 + $0x20] sm:$0xff] (!%p176_p9)  ;;  %v239_v7 = vld [vmem:[%s1049_s2 + $0x38] sm:$0xff] (!%p176_p9)  ;;  %s612_s6 = sshll.u32 (!%p176_p9), %s203_s5, 7 }
   0xf   : > { %260 = vperm.xlu1 (!%p176_p9), %668, %v234_v0   ;;  %250 = vperm.xlu0 (!%p176_p9), %667, %v232_v1   ;;  %v237_v5 = vld [vmem:[%s1049_s2 + $0x28] sm:$0xff] (!%p176_p9)  ;;  %v238_v8 = vld [vmem:[%s1049_s2 + $0x30] sm:$0xff] (!%p176_p9)  ;;  %v240_v10 = vld [vmem:[%s1049_s2 + $0x40] sm:$0xff] (!%p176_p9)  ;;  %s948_s7 = scalar_lea.vmem (!%p176_p9), [#allocation2], %s612_s6  ;;  %s624_s8 = sshll.u32 (!%p176_p9), %s783_s19, 11 }
  0x10   : > { %v241_v9 = vld [vmem:[%s1049_s2 + $0x48] sm:$0xff] (!%p176_p9)  ;;  %v243_v11 = vld [vmem:[%s1049_s2 + $0x58] sm:$0xff] (!%p176_p9)  ;;  %v242_v12 = vld [vmem:[%s1049_s2 + $0x50] sm:$0xff] (!%p176_p9)  ;;  %s534_s9 = sshll.u32 (!%p176_p9), %s948_s7, 4  ;;  %s998_s12 = scalar_lea.hbm (!%p176_p9), %s1051_s4, %s624_s8  ;;  %s1000_s9 = int_to_ptr.vmem [resolvable:$true] %s534_s9 }
  0x11   : > { %v245_v13 = vld [vmem:[%s1049_s2 + $0x68] sm:$0xff] (!%p176_p9)  ;;  %v244_v14 = vld [vmem:[%s1049_s2 + $0x60] sm:$0xff] (!%p176_p9)  ;;  %v247_v15 = vld [vmem:[%s1049_s2 + $0x78] sm:$0xff] (!%p176_p9)  ;;  %s669_s13 = scalar_lea.vmem (!%p176_p9), %s1000_s9, 2048 }
  0x12   : > { %v246_v16 = vld [vmem:[%s1049_s2 + $0x70] sm:$0xff] (!%p176_p9)  ;;  %v345_v17 = vld [vmem:[%s1050_s3 + $0x8] sm:$0xff] (!%p176_p9)  ;;  %v344_v18 = vld [vmem:[%s1050_s3] sm:$0xff] (!%p176_p9)  ;;  %p670_p11 = scmp.ne.s32.totalorder (!%p176_p9), %s1000_s9, %s669_s13 }
  0x13   : > { %265 = vperm.xlu1 (!%p176_p9), %668, %v235_v3   ;;  %255 = vperm.xlu0 (!%p176_p9), %667, %v233_v4   ;;  %v347_v19 = vld [vmem:[%s1050_s3 + $0x18] sm:$0xff] (!%p176_p9)  ;;  %v346_v20 = vld [vmem:[%s1050_s3 + $0x10] sm:$0xff] (!%p176_p9)  ;;  %v349_v21 = vld [vmem:[%s1050_s3 + $0x28] sm:$0xff] (!%p176_p9) }
  0x14   : > { %v348_v22 = vld [vmem:[%s1050_s3 + $0x20] sm:$0xff] (!%p176_p9)  ;;  %v351_v23 = vld [vmem:[%s1050_s3 + $0x38] sm:$0xff] (!%p176_p9)  ;;  %v350_v24 = vld [vmem:[%s1050_s3 + $0x30] sm:$0xff] (!%p176_p9)  ;;  %p671_p12 = pnand (!%p176_p9), %p670_p11, %p800_p5 }
  0x15   : > { %v353_v25 = vld [vmem:[%s1050_s3 + $0x48] sm:$0xff]  ;;  %v352_v26 = vld [vmem:[%s1050_s3 + $0x40] sm:$0xff]  ;;  %v355_v27 = vld [vmem:[%s1050_s3 + $0x58] sm:$0xff]  ;;  %s207_s14 = scalar_select %p206_p10, %s783_s19, 1 }
  0x16   : > { %v354_v28 = vld [vmem:[%s1050_s3 + $0x50] sm:$0xff]  ;;  %v357_v29 = vld [vmem:[%s1050_s3 + $0x68] sm:$0xff]  ;;  %v356_v30 = vld [vmem:[%s1050_s3 + $0x60] sm:$0xff]  ;;  %s1006_s19 = scalar_lea.sflag [#allocation3], %s203_s5  ;;  %p672_p13 = pneg %p671_p12 }
  0x17   : > { %275 = vperm.xlu1 %668, %v237_v5   ;;  %270 = vperm.xlu0 %667, %v236_v6   ;;  %v359_v31 = vld [vmem:[%s1050_s3 + $0x78] sm:$0xff]  ;;  %v358_v32 = vld [vmem:[%s1050_s3 + $0x70] sm:$0xff]  ;;  %s622_s20 = sshll.u32 %s207_s14, 7  ;;  %s734_s14 = smov [#allocation2]  }
  0x18   : > { %s923_s27 = scalar_lea.vmem %s1047_s0, %s622_s20  ;;  %s934_s30 = scalar_lea.vmem %s1048_s1, %s622_s20 }
  0x19   : > { %v216_v47 = vld [vmem:[%s923_s27] sm:$0xff]  ;;  %v217_v48 = vld [vmem:[%s923_s27 + $0x8] sm:$0xff]  ;;  %v218_v51 = vld [vmem:[%s923_s27 + $0x10] sm:$0xff]  ;;  %s673_s20 = sshll.u32 %s734_s14, 4  ;;  %s674_s20 = int_to_ptr.vmem [resolvable:$false] %s673_s20 }
  0x1a   : > { %v219_v54 = vld [vmem:[%s923_s27 + $0x18] sm:$0xff]  ;;  %v457_v56 = vld [vmem:[%s934_s30 + $0x8] sm:$0xff]  ;;  %v456_v58 = vld [vmem:[%s934_s30] sm:$0xff]  ;;  %s675_s22 = scalar_lea.vmem %s674_s20, 4096  ;;  %p676_p0 = scmp.lt.s32.totalorder %s1000_s9, %s674_s20 }
  0x1b   : > { %285 = vperm.xlu1 %668, %v239_v7   ;;  %280 = vperm.xlu0 %667, %v238_v8   ;;  %v221_v63 = vld [vmem:[%s923_s27 + $0x28] sm:$0xff]  ;;  %v220_v2 = vld [vmem:[%s923_s27 + $0x20] sm:$0xff]  ;;  %v459_v4 = vld [vmem:[%s934_s30 + $0x18] sm:$0xff]  ;;  %p677_p1 = scmp.lt.s32.totalorder %s675_s22, %s669_s13 }
  0x1c   : > { %v458_v6 = vld [vmem:[%s934_s30 + $0x10] sm:$0xff] }
  0x1d   : > { %p678_p2 = por %p677_p1, %p676_p0 }
  0x1f   : > { %295 = vperm.xlu1 %668, %v241_v9   ;;  %290 = vperm.xlu0 %667, %v240_v10   ;;  %p679_p3 = pnand %p678_p2, %p672_p13 }
  0x23   : > { %305 = vperm.xlu1 %668, %v243_v11   ;;  %300 = vperm.xlu0 %667, %v242_v12  }
  0x27   : > { %315 = vperm.xlu1 %668, %v245_v13   ;;  %310 = vperm.xlu0 %667, %v244_v14   ;;  %v223_v13 = vld [vmem:[%s923_s27 + $0x38] sm:$0xff] }
  0x2b   : > { %325 = vperm.xlu1 %668, %v247_v15   ;;  %320 = vperm.xlu0 %667, %v246_v16   ;;  %v222_v16 = vld [vmem:[%s923_s27 + $0x30] sm:$0xff] }
  0x2f   : > { %367 = vperm.xlu1 %668, %v345_v17   ;;  %362 = vperm.xlu0 %667, %v344_v18   ;;  %v461_v18 = vld [vmem:[%s934_s30 + $0x28] sm:$0xff] }
  0x33   : > { %377 = vperm.xlu1 %668, %v347_v19   ;;  %372 = vperm.xlu0 %667, %v346_v20   ;;  %v460_v20 = vld [vmem:[%s934_s30 + $0x20] sm:$0xff] }
  0x37   : > { %387 = vperm.xlu1 %668, %v349_v21   ;;  %382 = vperm.xlu0 %667, %v348_v22  }
  0x3b   : > { %397 = vperm.xlu1 %668, %v351_v23   ;;  %392 = vperm.xlu0 %667, %v350_v24  }
  0x3f   : > { %407 = vperm.xlu1 %668, %v353_v25   ;;  %402 = vperm.xlu0 %667, %v352_v26  }
  0x43   : > { %417 = vperm.xlu1 %668, %v355_v27   ;;  %412 = vperm.xlu0 %667, %v354_v28   ;;  %v225_v27 = vld [vmem:[%s923_s27 + $0x48] sm:$0xff] }
  0x47   : > { %427 = vperm.xlu1 %668, %v357_v29   ;;  %422 = vperm.xlu0 %667, %v356_v30   ;;  %v224_v30 = vld [vmem:[%s923_s27 + $0x40] sm:$0xff] }
  0x4b   : > { %437 = vperm.xlu1 %668, %v359_v31   ;;  %432 = vperm.xlu0 %667, %v358_v32   ;;  %v463_v32 = vld [vmem:[%s934_s30 + $0x38] sm:$0xff] }
  0x8e   : > { %v261_v33 = vpop.permute.xlu1 %260  ;;  %v251_v34 = vpop.permute.xlu0 %250 }
  0x8f   : > { %v328_v52 = vmul.f32 %v251_v34, %v216_v47  ;;  %v330_v61 = vmul.f32 %v261_v33, %v218_v51  ;;  %v462_v34 = vld [vmem:[%s934_s30 + $0x30] sm:$0xff]  ;;  %v227_v47 = vld [vmem:[%s923_s27 + $0x58] sm:$0xff] }
  0x92   : > { %v266_v35 = vpop.permute.xlu1 %265  ;;  %v256_v36 = vpop.permute.xlu0 %255 }
  0x93   : > { %v329_v53 = vmul.f32 %v256_v36, %v217_v48  ;;  %v331_v62 = vmul.f32 %v266_v35, %v219_v54  ;;  %v465_v54 = vld [vmem:[%s934_s30 + $0x48] sm:$0xff] }
  0x96   : > { %v276_v37 = vpop.permute.xlu1 %275  ;;  %v271_v38 = vpop.permute.xlu0 %270 }
  0x97   : > { %v333_v11 = vmul.f32 %v276_v37, %v221_v63  ;;  %v332_v12 = vmul.f32 %v271_v38, %v220_v2  ;;  %v467_v2 = vld [vmem:[%s934_s30 + $0x58] sm:$0xff] }
  0x9a   : > { %v286_v39 = vpop.permute.xlu1 %285  ;;  %v281_v40 = vpop.permute.xlu0 %280 }
  0x9b   : > { %v335_v25 = vmul.f32 %v286_v39, %v223_v13  ;;  %v334_v26 = vmul.f32 %v281_v40, %v222_v16  ;;  %v468_v16 = vld [vmem:[%s934_s30 + $0x60] sm:$0xff] }
  0x9e   : > { %v907_v41 = vpop.permute.xlu1 %295  ;;  %v909_v42 = vpop.permute.xlu0 %290 }
  0x9f   : > { %v337_v39 = vmul.f32 %v907_v41, %v225_v27  ;;  %v336_v40 = vmul.f32 %v909_v42, %v224_v30 }
  0xa2   : > { %v912_v43 = vpop.permute.xlu1 %305  ;;  %v914_v44 = vpop.permute.xlu0 %300 }
  0xa6   : > { %v916_v45 = vpop.permute.xlu1 %315  ;;  %v918_v46 = vpop.permute.xlu0 %310 }
  0xaa   : > { %v927_v49 = vpop.permute.xlu1 %325  ;;  %v929_v50 = vpop.permute.xlu0 %320 }
  0xae   : > { %v368_v55 = vpop.permute.xlu1 %367  ;;  %v363_v57 = vpop.permute.xlu0 %362 }
  0xaf   : > { %v441_v59 = vadd.f32 %v368_v55, %v329_v53  ;;  %v440_v60 = vadd.f32 %v363_v57, %v328_v52  ;;  %v226_v52 = vld [vmem:[%s923_s27 + $0x50] sm:$0xff] }
  0xb1   : > { %v473_v0 = vadd.f32 %v457_v56, %v441_v59  ;;  %v472_v1 = vadd.f32 %v456_v58, %v440_v60  ;;  %v464_v56 = vld [vmem:[%s934_s30 + $0x40] sm:$0xff]  ;;  %v339_v59 = vmul.f32 %v912_v43, %v227_v47  ;;  %v338_v60 = vmul.f32 %v914_v44, %v226_v52 }
  0xb2   : > { %v378_v3 = vpop.permute.xlu1 %377  ;;  %v373_v5 = vpop.permute.xlu0 %372 }
  0xb3   : > { %v489_v7 = vmax.f32 %v473_v0, 0.0  ;;  %v488_v8 = vmax.f32 %v472_v1, 0.0  ;;  %v443_v9 = vadd.f32 %v378_v3, %v331_v62  ;;  %v442_v10 = vadd.f32 %v373_v5, %v330_v61  ;;  %v229_v61 = vld [vmem:[%s923_s27 + $0x68] sm:$0xff]  ;;  %v228_v0 = vld [vmem:[%s923_s27 + $0x60] sm:$0xff] }
  0xb5   : > { %505 = vst [vmem:[%s948_s7 + $0x8] sm:$0xff] %v489_v7  ;;  %504 = vst [vmem:[%s948_s7] sm:$0xff] %v488_v8  ;;  %v475_v14 = vadd.f32 %v459_v4, %v443_v9  ;;  %v474_v15 = vadd.f32 %v458_v6, %v442_v10  ;;  %v466_v4 = vld [vmem:[%s934_s30 + $0x50] sm:$0xff]  ;;  %v341_v7 = vmul.f32 %v916_v45, %v229_v61  ;;  %v231_v9 = vld [vmem:[%s923_s27 + $0x78] sm:$0xff] }
  0xb6   : > { %v388_v17 = vpop.permute.xlu1 %387  ;;  %v383_v19 = vpop.permute.xlu0 %382  ;;  %v340_v8 = vmul.f32 %v918_v46, %v228_v0  ;;  %v343_v46 = vmul.f32 %v927_v49, %v231_v9 }
  0xb7   : > { %v491_v21 = vmax.f32 %v475_v14, 0.0  ;;  %v490_v22 = vmax.f32 %v474_v15, 0.0  ;;  %v445_v23 = vadd.f32 %v388_v17, %v333_v11  ;;  %v444_v24 = vadd.f32 %v383_v19, %v332_v12  ;;  %v230_v12 = vld [vmem:[%s923_s27 + $0x70] sm:$0xff]  ;;  %v469_v14 = vld [vmem:[%s934_s30 + $0x68] sm:$0xff] }
  0xb9   : > { %507 = vst [vmem:[%s948_s7 + $0x18] sm:$0xff] %v491_v21  ;;  %506 = vst [vmem:[%s948_s7 + $0x10] sm:$0xff] %v490_v22  ;;  %v477_v28 = vadd.f32 %v461_v18, %v445_v23  ;;  %v476_v29 = vadd.f32 %v460_v20, %v444_v24  ;;  %v342_v20 = vmul.f32 %v929_v50, %v230_v12  ;;  %v471_v24 = vld [vmem:[%s934_s30 + $0x78] sm:$0xff] }
  0xba   : > { %v398_v31 = vpop.permute.xlu1 %397  ;;  %v393_v33 = vpop.permute.xlu0 %392 }
  0xbb   : > { %v493_v35 = vmax.f32 %v477_v28, 0.0  ;;  %v492_v36 = vmax.f32 %v476_v29, 0.0  ;;  %v447_v37 = vadd.f32 %v398_v31, %v335_v25  ;;  %v446_v38 = vadd.f32 %v393_v33, %v334_v26  ;;  %v470_v26 = vld [vmem:[%s934_s30 + $0x70] sm:$0xff] }
  0xbd   : > { %509 = vst [vmem:[%s948_s7 + $0x28] sm:$0xff] %v493_v35  ;;  %508 = vst [vmem:[%s948_s7 + $0x20] sm:$0xff] %v492_v36  ;;  %v479_v48 = vadd.f32 %v463_v32, %v447_v37  ;;  %v478_v51 = vadd.f32 %v462_v34, %v446_v38 }
  0xbe   : > { %v408_v53 = vpop.permute.xlu1 %407  ;;  %v403_v55 = vpop.permute.xlu0 %402 }
  0xbf   : > { %v495_v57 = vmax.f32 %v479_v48, 0.0  ;;  %v494_v41 = vmax.f32 %v478_v51, 0.0  ;;  %v449_v58 = vadd.f32 %v408_v53, %v337_v39  ;;  %v448_v42 = vadd.f32 %v403_v55, %v336_v40 }
  0xc1   : > { %511 = vst [vmem:[%s948_s7 + $0x38] sm:$0xff] %v495_v57  ;;  %510 = vst [vmem:[%s948_s7 + $0x30] sm:$0xff] %v494_v41  ;;  %v481_v62 = vadd.f32 %v465_v54, %v449_v58  ;;  %v480_v63 = vadd.f32 %v464_v56, %v448_v42 }
  0xc2   : > { %v418_v1 = vpop.permute.xlu1 %417  ;;  %v413_v3 = vpop.permute.xlu0 %412 }
  0xc3   : > { %v497_v5 = vmax.f32 %v481_v62, 0.0  ;;  %v496_v43 = vmax.f32 %v480_v63, 0.0  ;;  %v451_v6 = vadd.f32 %v418_v1, %v339_v59  ;;  %v450_v44 = vadd.f32 %v413_v3, %v338_v60 }
  0xc5   : > { %513 = vst [vmem:[%s948_s7 + $0x48] sm:$0xff] %v497_v5  ;;  %512 = vst [vmem:[%s948_s7 + $0x40] sm:$0xff] %v496_v43  ;;  %v483_v10 = vadd.f32 %v467_v2, %v451_v6  ;;  %v482_v11 = vadd.f32 %v466_v4, %v450_v44 }
  0xc6   : > { %v428_v13 = vpop.permute.xlu1 %427  ;;  %v423_v15 = vpop.permute.xlu0 %422 }
  0xc7   : > { %v499_v17 = vmax.f32 %v483_v10, 0.0  ;;  %v498_v18 = vmax.f32 %v482_v11, 0.0  ;;  %v453_v19 = vadd.f32 %v428_v13, %v341_v7  ;;  %v452_v45 = vadd.f32 %v423_v15, %v340_v8 }
  0xc9   : > { %515 = vst [vmem:[%s948_s7 + $0x58] sm:$0xff] %v499_v17  ;;  %514 = vst [vmem:[%s948_s7 + $0x50] sm:$0xff] %v498_v18  ;;  %v485_v21 = vadd.f32 %v469_v14, %v453_v19  ;;  %v484_v22 = vadd.f32 %v468_v16, %v452_v45 }
  0xca   : > { %v438_v23 = vpop.permute.xlu1 %437  ;;  %v433_v25 = vpop.permute.xlu0 %432 }
  0xcb   : > { %v501_v27 = vmax.f32 %v485_v21, 0.0  ;;  %v500_v28 = vmax.f32 %v484_v22, 0.0  ;;  %v455_v29 = vadd.f32 %v438_v23, %v343_v46  ;;  %v454_v30 = vadd.f32 %v433_v25, %v342_v20 }
  0xcd   : > { %517 = vst [vmem:[%s948_s7 + $0x68] sm:$0xff] %v501_v27  ;;  %516 = vst [vmem:[%s948_s7 + $0x60] sm:$0xff] %v500_v28  ;;  %v487_v49 = vadd.f32 %v471_v24, %v455_v29  ;;  %v486_v50 = vadd.f32 %v470_v26, %v454_v30 }
  0xcf   : > { %v503_v31 = vmax.f32 %v487_v49, 0.0  ;;  %v502_v32 = vmax.f32 %v486_v50, 0.0 }
  0xd1   : > { %519 = vst [vmem:[%s948_s7 + $0x78] sm:$0xff] %v503_v31  ;;  %518 = vst [vmem:[%s948_s7 + $0x70] sm:$0xff] %v502_v32 }
  0xd2   : > { %682 = shalt.err (!%p679_p3)
}
  0xd3   : > { %s683_s23 = scalar_lea.hbm %s998_s12, 2048  ;;  %s687_s29 = scalar_lea.hbm %s1051_s4, 4096 }
  0xd4   : > { %p684_p4 = scmp.ne.s32.totalorder %s998_s12, %s683_s23  ;;  %p688_p9 = scmp.lt.u32.totalorder %s998_s12, %s1051_s4 }
  0xd5   : > { %p689_p10 = scmp.lt.u32.totalorder %s687_s29, %s683_s23  ;;  %p691_p12 = scmp.lt.u32.totalorder %s683_s23, %s998_s12 }
  0xd6   : > { %p685_p7 = pnand %p684_p4, %p800_p5 }
  0xd7   : > { %p690_p11 = por %p689_p10, %p688_p9 }
  0xd8   : > { %p686_p8 = pneg %p685_p7 }
  0xd9   : > { %p692_p13 = por %p691_p12, %p690_p11 }
  0xdb   : > { %p693_p0 = pnand %p692_p13, %p686_p8 }
  0xdd   : > { %696 = shalt.err (!%p693_p0)
}
  0xde   : > { %s735_s6 = smov 128   ;;  %s736_s7 = smov 8  }
  0xdf   : > { %625 = dma.vmem_to_hbm [thread:$0]  (%p800_p5), %s1000_s9, 2048, %s998_s12, %s1006_s19, %s735_s6, %s735_s6, %s736_s7  }
  0xe0 PF: > { %p631_p1 = scmp.ge.s32.totalorder %s731_s18, 2  ;;  %s549_s8 = sand.u32 1, %s719_s15  }
  0xe1   : > { %s550_s10 = scalar_lea.sflag [#allocation3], %s549_s8 }
  0xe2   : > { %p628_p2 = pnand %p631_p1, %p804_p6 }
  0xe4   : > { %714 = dma.done.wait (!%p628_p2), %s550_s10, 2048  }
  0xe5   : > { %716 = vsyncadd (!%p628_p2), %s550_s10, 4294965248  ;;  %p14_p3 = scmp.ge.s32.totalorder %s787_s21, 4   ;;  %s1054_s15 = smov %s723_s16 }
  0xe6   : > { %s1055_s16 = smov %s727_s17  ;;  %s1056_s17 = smov %s798_s24 }
  0xe7   : > { %s1057_s18 = smov %s787_s21  ;;  %16 = sbr.rel (!%p14_p3) target bundleno = 3 (0x3), region = 74 }
  0xee   :  { %555 = vsyncpa [#allocation3], 1 }
  0xef   :  { %557 = vsyncpa [#allocation3 + $0x1], 1 }

</bundles_post_ra>
